<compile_context>
chip_gen: v7x
topology: tpu7x:2x2x1
jax: 0.10.0
libtpu: 0.0.40
codegen_flags: <defaults>
</compile_context>

<pallas_src>
import functools
import math

import jax
import jax.numpy as jnp
from jax.experimental import pallas as pl
from jax.experimental.pallas import tpu as pltpu


# Tile preferences.  Chosen so 2 (bf16) inputs x 2 buffers + an f32 accumulator
# stay well under the 32 MiB scoped-VMEM default even on v7x (64 MiB total).
_TM = 256   # row tile
_TN = 256   # output-feature tile
_TK = 512   # contraction tile
_TH = 512   # MLP hidden tile


def _fit(dim, pref):
    """Tile = `pref` if it divides `dim`, else the full dim (small test shapes).
    TODO(synk): at production sizes pad ragged dims (e.g. vocab) to a multiple
    of 128 instead of falling back to the full extent."""
    return pref if (dim >= pref and dim % pref == 0) else dim


# ----------------------------------------------------------------------------
# Fused LayerNorm + Linear (prologue LN, epilogue bias/activation)
# ----------------------------------------------------------------------------
def _ln_linear_kernel(x_ref, g_ref, bln_ref, w_ref, *rest, eps, has_bias, activation):
    if has_bias:
        b_ref, o_ref = rest
    else:
        (o_ref,) = rest
    x = x_ref[...].astype(jnp.float32)
    mu = jnp.mean(x, axis=-1, keepdims=True)
    var = jnp.mean(jnp.square(x - mu), axis=-1, keepdims=True)
    xn = (x - mu) * jax.lax.rsqrt(var + eps) * g_ref[...] + bln_ref[...]
    y = jnp.dot(xn.astype(jnp.bfloat16), w_ref[...],
                preferred_element_type=jnp.float32)
    if has_bias:
        y = y + b_ref[...]
    if activation == "gelu":
        y = jax.nn.gelu(y, approximate=True)   # GPT-2 tanh-approx GELU
    o_ref[...] = y.astype(o_ref.dtype)


def ln_linear(x, gamma, beta, w, b=None, activation=None,
              out_dtype=jnp.bfloat16, eps=1e-5):
    """y = act(LayerNorm(x) @ w + b).  x:[M,K] (K = full feature dim), w:[K,N]."""
    M, K = x.shape
    K2, N = w.shape
    assert K == K2
    tm = _fit(M, _TM)
    tn = _fit(N, _TN)
    has_bias = b is not None

    in_specs = [
        pl.BlockSpec((tm, K), lambda i, j: (i, 0)),
        pl.BlockSpec((1, K), lambda i, j: (0, 0)),
        pl.BlockSpec((1, K), lambda i, j: (0, 0)),
        pl.BlockSpec((K, tn), lambda i, j: (0, j)),
    ]
    args = [x.astype(jnp.bfloat16),
            gamma.reshape(1, K).astype(jnp.float32),
            beta.reshape(1, K).astype(jnp.float32),
            w.astype(jnp.bfloat16)]
    if has_bias:
        in_specs.append(pl.BlockSpec((1, tn), lambda i, j: (0, j)))
        args.append(b.reshape(1, N).astype(jnp.float32))

    kernel = functools.partial(_ln_linear_kernel, eps=eps, has_bias=has_bias,
                               activation=activation)
    return pl.pallas_call(
        kernel,
        out_shape=jax.ShapeDtypeStruct((M, N), out_dtype),
        grid=(M // tm, N // tn),
        in_specs=in_specs,
        out_specs=pl.BlockSpec((tm, tn), lambda i, j: (i, j)),
        compiler_params=pltpu.CompilerParams(
            dimension_semantics=("parallel", "parallel")),
        cost_estimate=pl.CostEstimate(
            flops=2 * M * N * K, transcendentals=0,
            bytes_accessed=2 * (M * K + K * N) + M * N * 2),
    )(*args)


# ----------------------------------------------------------------------------
# Tiled Linear (K-tiled, f32 accumulator, fused bias / activation / residual)
# ----------------------------------------------------------------------------
def _linear_kernel(*refs, has_bias, has_residual, activation):
    x_ref, w_ref = refs[0], refs[1]
    idx = 2
    b_ref = r_ref = None
    if has_bias:
        b_ref = refs[idx]
        idx += 1
    if has_residual:
        r_ref = refs[idx]
        idx += 1
    o_ref, acc_ref = refs[idx], refs[idx + 1]

    @pl.when(pl.program_id(2) == 0)
    def _():
        acc_ref[...] = jnp.zeros_like(acc_ref)

    acc_ref[...] += jnp.dot(x_ref[...], w_ref[...],
                            preferred_element_type=jnp.float32)

    @pl.when(pl.program_id(2) == pl.num_programs(2) - 1)
    def _():
        y = acc_ref[...]
        if has_bias:
            y = y + b_ref[...]
        if activation == "gelu":
            y = jax.nn.gelu(y, approximate=True)
        if has_residual:
            y = y + r_ref[...].astype(jnp.float32)
        o_ref[...] = y.astype(o_ref.dtype)


def linear(x, w, b=None, residual=None, activation=None, out_dtype=jnp.bfloat16):
    """y = act(x @ w + b) + residual.  x:[M,K] w:[K,N]."""
    M, K = x.shape
    K2, N = w.shape
    assert K == K2
    tm = _fit(M, _TM)
    tn = _fit(N, _TN)
    tk = _fit(K, _TK)
    has_bias = b is not None
    has_residual = residual is not None

    in_specs = [pl.BlockSpec((tm, tk), lambda i, j, k: (i, k)),
                pl.BlockSpec((tk, tn), lambda i, j, k: (k, j))]
    args = [x.astype(jnp.bfloat16), w.astype(jnp.bfloat16)]
    if has_bias:
        in_specs.append(pl.BlockSpec((1, tn), lambda i, j, k: (0, j)))
        args.append(b.reshape(1, N).astype(jnp.float32))
    if has_residual:
        in_specs.append(pl.BlockSpec((tm, tn), lambda i, j, k: (i, j)))
        args.append(residual.astype(jnp.bfloat16))

    kernel = functools.partial(_linear_kernel, has_bias=has_bias,
                               has_residual=has_residual, activation=activation)
    return pl.pallas_call(
        kernel,
        out_shape=jax.ShapeDtypeStruct((M, N), out_dtype),
        grid=(M // tm, N // tn, K // tk),
        in_specs=in_specs,
        out_specs=pl.BlockSpec((tm, tn), lambda i, j, k: (i, j)),
        scratch_shapes=[pltpu.VMEM((tm, tn), jnp.float32)],
        compiler_params=pltpu.CompilerParams(
            dimension_semantics=("parallel", "parallel", "arbitrary")),
        cost_estimate=pl.CostEstimate(
            flops=2 * M * N * K, transcendentals=0,
            bytes_accessed=2 * (M * K + K * N) + 4 * M * N),
    )(*args)


# ----------------------------------------------------------------------------
# Fused MLP block: LayerNorm + fc + GELU + proj + bias + residual
# (4D hidden never leaves VMEM; tiled over the hidden axis)
# ----------------------------------------------------------------------------
def _mlp_kernel(x_ref, g_ref, bln_ref, wfc_ref, bfc_ref, wpr_ref, bpr_ref,
                o_ref, xn_ref, acc_ref, *, eps):
    @pl.when(pl.program_id(1) == 0)
    def _():
        x = x_ref[...].astype(jnp.float32)
        mu = jnp.mean(x, axis=-1, keepdims=True)
        var = jnp.mean(jnp.square(x - mu), axis=-1, keepdims=True)
        xn = (x - mu) * jax.lax.rsqrt(var + eps) * g_ref[...] + bln_ref[...]
        xn_ref[...] = xn.astype(jnp.bfloat16)
        acc_ref[...] = jnp.zeros_like(acc_ref)

    hmid = jnp.dot(xn_ref[...], wfc_ref[...],
                   preferred_element_type=jnp.float32) + bfc_ref[...]
    hmid = jax.nn.gelu(hmid, approximate=True)
    acc_ref[...] += jnp.dot(hmid.astype(jnp.bfloat16), wpr_ref[...],
                            preferred_element_type=jnp.float32)

    @pl.when(pl.program_id(1) == pl.num_programs(1) - 1)
    def _():
        y = acc_ref[...] + bpr_ref[...] + x_ref[...].astype(jnp.float32)
        o_ref[...] = y.astype(o_ref.dtype)


def fused_mlp(x, gamma, beta, w_fc, b_fc, w_proj, b_proj,
              out_dtype=jnp.bfloat16, eps=1e-5):
    M, D = x.shape
    D2, H = w_fc.shape
    assert D == D2 and w_proj.shape == (H, D)
    tm = _fit(M, _TM)
    th = _fit(H, _TH)

    kernel = functools.partial(_mlp_kernel, eps=eps)
    return pl.pallas_call(
        kernel,
        out_shape=jax.ShapeDtypeStruct((M, D), out_dtype),
        grid=(M // tm, H // th),
        in_specs=[
            pl.BlockSpec((tm, D), lambda i, h: (i, 0)),
            pl.BlockSpec((1, D), lambda i, h: (0, 0)),
            pl.BlockSpec((1, D), lambda i, h: (0, 0)),
            pl.BlockSpec((D, th), lambda i, h: (0, h)),
            pl.BlockSpec((1, th), lambda i, h: (0, h)),
            pl.BlockSpec((th, D), lambda i, h: (h, 0)),
            pl.BlockSpec((1, D), lambda i, h: (0, 0)),
        ],
        out_specs=pl.BlockSpec((tm, D), lambda i, h: (i, 0)),
        scratch_shapes=[pltpu.VMEM((tm, D), jnp.bfloat16),
                        pltpu.VMEM((tm, D), jnp.float32)],
        compiler_params=pltpu.CompilerParams(
            dimension_semantics=("parallel", "arbitrary")),
        cost_estimate=pl.CostEstimate(
            flops=4 * M * H * D, transcendentals=M * H,
            bytes_accessed=2 * (2 * M * D + 2 * D * H)),
    )(x.astype(jnp.bfloat16),
      gamma.reshape(1, D).astype(jnp.float32),
      beta.reshape(1, D).astype(jnp.float32),
      w_fc.astype(jnp.bfloat16), b_fc.reshape(1, H).astype(jnp.float32),
      w_proj.astype(jnp.bfloat16), b_proj.reshape(1, D).astype(jnp.float32))


# ----------------------------------------------------------------------------
# Attention: per-batch, all heads, lane-dense [B, T, D] output.
# Optional single 'memory' K/V slot handled in-kernel (no HBM concat).
# TODO(synk): for long sequences convert to flash-style KV tiling; the full
#             [T, T] score tile here is VMEM-quadratic.
# ----------------------------------------------------------------------------
def _attention_kernel(qkv_ref, *rest, n_head, scale, has_mem):
    if has_mem:
        mem_ref, o_ref = rest
    else:
        (o_ref,) = rest

    qkv = qkv_ref[0]                     # [T, 3D] bf16
    T = qkv.shape[0]
    D = qkv.shape[1] // 3
    dh = D // n_head
    q = qkv[:, :D]
    k = qkv[:, D:2 * D]
    v = qkv[:, 2 * D:]
    if has_mem:
        m = mem_ref[0]                   # [1, 3D] bf16 (memory query is unused)
        mem_k = m[:, D:2 * D]
        mem_v = m[:, 2 * D:]

    row = jax.lax.broadcasted_iota(jnp.int32, (T, T), 0)
    col = jax.lax.broadcasted_iota(jnp.int32, (T, T), 1)
    causal = col <= row

    outs = []
    for h in range(n_head):              # static unroll over heads
        sl = slice(h * dh, (h + 1) * dh)
        qh, kh, vh = q[:, sl], k[:, sl], v[:, sl]
        s = jnp.dot(qh, kh.T, preferred_element_type=jnp.float32) * scale
        s = jnp.where(causal, s, -1e30)
        if has_mem:
            # memory slot is visible to every query position
            s_m = jnp.dot(qh, mem_k[:, sl].T,
                          preferred_element_type=jnp.float32) * scale   # [T,1]
            m_row = jnp.maximum(jnp.max(s, axis=-1, keepdims=True), s_m)
            e = jnp.exp(s - m_row)
            e_m = jnp.exp(s_m - m_row)
            inv = pl.reciprocal(jnp.sum(e, axis=-1, keepdims=True) + e_m,
                                approx=True)
            o = jnp.dot((e * inv).astype(jnp.bfloat16), vh,
                        preferred_element_type=jnp.float32)
            o = o + (e_m * inv) * mem_v[:, sl].astype(jnp.float32)
        else:
            m_row = jnp.max(s, axis=-1, keepdims=True)
            e = jnp.exp(s - m_row)
            inv = pl.reciprocal(jnp.sum(e, axis=-1, keepdims=True), approx=True)
            o = jnp.dot((e * inv).astype(jnp.bfloat16), vh,
                        preferred_element_type=jnp.float32)
        outs.append(o)

    o_ref[0] = jnp.concatenate(outs, axis=-1).astype(o_ref.dtype)   # lane-dense


def attention(qkv, mem_qkv, n_head):
    """qkv:[B,T,3D] (mem_qkv:[B,1,3D] or None) -> [B,T,D] causal self-attn."""
    B, T, threeD = qkv.shape
    D = threeD // 3
    dh = D // n_head
    has_mem = mem_qkv is not None

    in_specs = [pl.BlockSpec((1, T, threeD), lambda b: (b, 0, 0))]
    args = [qkv.astype(jnp.bfloat16)]
    if has_mem:
        in_specs.append(pl.BlockSpec((1, 1, threeD), lambda b: (b, 0, 0)))
        args.append(mem_qkv.astype(jnp.bfloat16))

    kernel = functools.partial(_attention_kernel, n_head=n_head,
                               scale=1.0 / math.sqrt(dh), has_mem=has_mem)
    return pl.pallas_call(
        kernel,
        out_shape=jax.ShapeDtypeStruct((B, T, D), jnp.bfloat16),
        grid=(B,),
        in_specs=in_specs,
        out_specs=pl.BlockSpec((1, T, D), lambda b: (b, 0, 0)),
        compiler_params=pltpu.CompilerParams(dimension_semantics=("parallel",)),
    )(*args)


# ----------------------------------------------------------------------------
# GPT-2-style core module + CVAEDecoder forward (glue in plain JAX)
# ----------------------------------------------------------------------------
def transformer_block(h, p, n_head, mem):
    B, T, D = h.shape
    h2 = h.reshape(B * T, D)

    # fused LN1 + QKV projection; memory slot gets its own (tiny) LN+QKV call,
    # which is mathematically identical to the concatenated-sequence version
    # since LN and the projection are row-wise.
    qkv = ln_linear(h2, p["ln1_g"], p["ln1_b"], p["w_qkv"], p["b_qkv"])
    qkv = qkv.reshape(B, T, 3 * D)
    mem_qkv = None
    if mem is not None:
        mem_qkv = ln_linear(mem.reshape(B, D), p["ln1_g"], p["ln1_b"],
                            p["w_qkv"], p["b_qkv"]).reshape(B, 1, 3 * D)

    a = attention(qkv, mem_qkv, n_head)                       # [B, T, D]
    # attention output projection with fused bias + residual add
    h2 = linear(a.reshape(B * T, D), p["w_proj"], p["b_proj"], residual=h2)

    # fused LN2 + fc + GELU + proj + residual (hidden stays in VMEM)
    h2 = fused_mlp(h2, p["ln2_g"], p["ln2_b"], p["w_fc"], p["b_fc"],
                   p["w_mlp_proj"], p["b_mlp_proj"])
    return h2.reshape(B, T, D)


def core_forward(params, input_ids, type_ids, extra_hidden_states,
                 extra_embedding, n_head):
    B, T = input_ids.shape
    pos = jnp.arange(T)
    # embedding lookups are gathers -> plain JAX glue
    h = (params["wte"][input_ids].astype(jnp.float32)
         + params["wpe"][pos][None, :, :].astype(jnp.float32)
         + params["wtte"][type_ids].astype(jnp.float32))
    if extra_embedding is not None:
        h = h + extra_embedding.astype(jnp.float32)   # [B,1,D] broadcast
    h = h.astype(jnp.bfloat16)
    for l, blk in enumerate(params["blocks"]):
        mem = extra_hidden_states[l] if extra_hidden_states is not None else None
        h = transformer_block(h, blk, n_head, mem)
    return h   # final ln_f is fused into the lm_head kernel


def cvae_decoder_forward(params, input_ids, type_ids, latent_sample,
                         inject_type, n_layer, n_head):
    D = params["wte"].shape[1]
    B, T = input_ids.shape

    extra_hidden_states = None
    extra_embedding = None
    if latent_sample is None:
        pass
    elif inject_type == "memory":
        lat = linear(latent_sample, params["latent_head_memory"])     # [B, D*L]
        extra_hidden_states = [lat[:, l * D:(l + 1) * D][:, None, :]
                               for l in range(n_layer)]
    elif inject_type == "embedding":
        lat = linear(latent_sample, params["latent_head_embedding"])  # [B, D]
        extra_embedding = lat[:, None, :]
    else:
        raise ValueError("unknown injection type")

    h = core_forward(params, input_ids, type_ids, extra_hidden_states,
                     extra_embedding, n_head)

    # lm_head weight-tied to wte; the [D, V] layout is materialized once at
    # init (params["wte_out"]) -- no per-call transpose.  ln_f is fused into
    # the kernel prologue; output tiled over the vocab axis.
    logits = ln_linear(h.reshape(B * T, D), params["ln_f_g"], params["ln_f_b"],
                       params["wte_out"], b=None, out_dtype=jnp.float32)
    return logits.reshape(B, T, -1)


# ----------------------------------------------------------------------------
# Deterministic parameter init (matmul weights in bf16, LN params in f32)
# ----------------------------------------------------------------------------
def init_params(key, V, D, n_layer, n_head, T_max, z_dim, n_type=2):
    keys = iter(jax.random.split(key, 8 + 6 * n_layer))

    def nrm(shape, scale=0.02):
        w = scale * jax.random.normal(next(keys), shape, dtype=jnp.float32)
        return w.astype(jnp.bfloat16)

    wte = nrm((V, D))
    params = {
        "wte": wte,
        "wte_out": wte.T,                  # weight-tied lm_head, [D, V] layout
        "wpe": nrm((T_max, D)),
        "wtte": nrm((n_type, D)),
        "ln_f_g": jnp.ones((D,), jnp.float32),
        "ln_f_b": jnp.zeros((D,), jnp.float32),
        "latent_head_memory": nrm((z_dim, D * n_layer)),
        "latent_head_embedding": nrm((z_dim, D)),
        "blocks": [],
    }
    for _ in range(n_layer):
        params["blocks"].append({
            "ln1_g": jnp.ones((D,), jnp.float32), "ln1_b": jnp.zeros((D,), jnp.float32),
            "w_qkv": nrm((D, 3 * D)), "b_qkv": jnp.zeros((3 * D,), jnp.float32),
            "w_proj": nrm((D, D)), "b_proj": jnp.zeros((D,), jnp.float32),
            "ln2_g": jnp.ones((D,), jnp.float32), "ln2_b": jnp.zeros((D,), jnp.float32),
            "w_fc": nrm((D, 4 * D)), "b_fc": jnp.zeros((4 * D,), jnp.float32),
            "w_mlp_proj": nrm((4 * D, D)), "b_mlp_proj": jnp.zeros((D,), jnp.float32),
        })
    return params


# ----------------------------------------------------------------------------
if __name__ == "__main__":
    B, T, V, D, n_layer, n_head, z_dim = 2, 8, 64, 32, 2, 2, 16
    pad_id = 0  # unused in forward (kept for parity with the PyTorch module)

    key = jax.random.PRNGKey(0)
    k_params, k_ids, k_types, k_z = jax.random.split(key, 4)

    params = init_params(k_params, V, D, n_layer, n_head, T, z_dim)
    input_ids = jax.random.randint(k_ids, (B, T), 0, V)
    type_ids = jax.random.randint(k_types, (B, T), 0, 2)
    latent = jax.random.normal(k_z, (B, z_dim), dtype=jnp.float32)

    fwd = jax.jit(cvae_decoder_forward, static_argnums=(4, 5, 6))

    logits_mem = fwd(params, input_ids, type_ids, latent, "memory", n_layer, n_head)
    logits_emb = fwd(params, input_ids, type_ids, latent, "embedding", n_layer, n_head)
    logits_none = fwd(params, input_ids, type_ids, None, "memory", n_layer, n_head)

    jax.block_until_ready((logits_mem, logits_emb, logits_none))
    assert logits_mem.shape == (B, T, V)
    assert logits_emb.shape == (B, T, V)
    assert logits_none.shape == (B, T, V)
    assert jnp.all(jnp.isfinite(logits_mem))
    assert jnp.all(jnp.isfinite(logits_emb))
    assert jnp.all(jnp.isfinite(logits_none))
    print("KERNEL_OK")
</pallas_src>

<mosaic_0001>
module attributes {stable_mosaic.version = 11 : i64} {
  func.func @_ln_linear_kernel(%arg0: i32, %arg1: i32, %arg2: memref<16x32xbf16, #tpu.memory_space<vmem>>, %arg3: memref<1x32xf32, #tpu.memory_space<vmem>>, %arg4: memref<1x32xf32, #tpu.memory_space<vmem>>, %arg5: memref<32x96xbf16, #tpu.memory_space<vmem>>, %arg6: memref<1x96xf32, #tpu.memory_space<vmem>>, %arg7: memref<16x96xbf16, #tpu.memory_space<vmem>>) attributes {dimension_semantics = [#tpu.dimension_semantics<parallel>, #tpu.dimension_semantics<parallel>], iteration_bounds = array<i64: 1, 1>, scalar_prefetch = 0 : i64, scratch_operands = 0 : i64, tpu.core_type = #tpu.core_type<tc>, window_params = [{transform_indices = @transform_0, window_bounds = array<i64: 16, 32>}, {pipeline_mode = #tpu.pipeline_mode<synchronous>, transform_indices = @transform_1, window_bounds = array<i64: 1, 32>}, {pipeline_mode = #tpu.pipeline_mode<synchronous>, transform_indices = @transform_2, window_bounds = array<i64: 1, 32>}, {transform_indices = @transform_3, window_bounds = array<i64: 32, 96>}, {transform_indices = @transform_4, window_bounds = array<i64: 1, 96>}, {transform_indices = @transform_5, window_bounds = array<i64: 16, 96>}]} {
    %c0 = arith.constant 0 : index
    %c0_0 = arith.constant 0 : index
    %0 = vector.load %arg2[%c0, %c0_0] : memref<16x32xbf16, #tpu.memory_space<vmem>>, vector<16x32xbf16>
    %1 = arith.extf %0 : vector<16x32xbf16> to vector<16x32xf32>
    %cst = arith.constant dense<0.000000e+00> : vector<16xf32>
    %2 = vector.multi_reduction <add>, %1, %cst [1] : vector<16x32xf32> to vector<16xf32>
    %3 = vector.shape_cast %2 : vector<16xf32> to vector<16x1xf32>
    %cst_1 = arith.constant 3.200000e+01 : f32
    %4 = vector.broadcast %cst_1 : f32 to vector<16x1xf32>
    %5 = arith.divf %3, %4 : vector<16x1xf32>
    %6 = vector.broadcast %5 : vector<16x1xf32> to vector<16x32xf32>
    %7 = arith.subf %1, %6 : vector<16x32xf32>
    %8 = arith.mulf %7, %7 : vector<16x32xf32>
    %cst_2 = arith.constant dense<0.000000e+00> : vector<16xf32>
    %9 = vector.multi_reduction <add>, %8, %cst_2 [1] : vector<16x32xf32> to vector<16xf32>
    %10 = vector.shape_cast %9 : vector<16xf32> to vector<16x1xf32>
    %cst_3 = arith.constant 3.200000e+01 : f32
    %11 = vector.broadcast %cst_3 : f32 to vector<16x1xf32>
    %12 = arith.divf %10, %11 : vector<16x1xf32>
    %13 = vector.broadcast %5 : vector<16x1xf32> to vector<16x32xf32>
    %14 = arith.subf %1, %13 : vector<16x32xf32>
    %cst_4 = arith.constant 9.99999974E-6 : f32
    %15 = vector.broadcast %cst_4 : f32 to vector<16x1xf32>
    %16 = arith.addf %12, %15 : vector<16x1xf32>
    %17 = math.rsqrt %16 : vector<16x1xf32>
    %18 = vector.broadcast %17 : vector<16x1xf32> to vector<16x32xf32>
    %19 = arith.mulf %14, %18 : vector<16x32xf32>
    %c0_5 = arith.constant 0 : index
    %c0_6 = arith.constant 0 : index
    %20 = vector.load %arg3[%c0_5, %c0_6] : memref<1x32xf32, #tpu.memory_space<vmem>>, vector<1x32xf32>
    %21 = vector.broadcast %20 : vector<1x32xf32> to vector<16x32xf32>
    %22 = arith.mulf %19, %21 : vector<16x32xf32>
    %c0_7 = arith.constant 0 : index
    %c0_8 = arith.constant 0 : index
    %23 = vector.load %arg4[%c0_7, %c0_8] : memref<1x32xf32, #tpu.memory_space<vmem>>, vector<1x32xf32>
    %24 = vector.broadcast %23 : vector<1x32xf32> to vector<16x32xf32>
    %25 = arith.addf %22, %24 : vector<16x32xf32>
    %26 = arith.truncf %25 : vector<16x32xf32> to vector<16x32xbf16>
    %c0_9 = arith.constant 0 : index
    %c0_10 = arith.constant 0 : index
    %27 = vector.load %arg5[%c0_9, %c0_10] : memref<32x96xbf16, #tpu.memory_space<vmem>>, vector<32x96xbf16>
    %cst_11 = arith.constant dense<0.000000e+00> : vector<16x96xf32>
    %28 = tpu.matmul %26, %27, %cst_11 {dimension_numbers = #tpu.dot_dimension_numbers<[1], [0], [0], [1], [0, 0, 1, 1], [], []>} : vector<16x32xbf16>, vector<32x96xbf16>, vector<16x96xf32> -> vector<16x96xf32>
    %c0_12 = arith.constant 0 : index
    %c0_13 = arith.constant 0 : index
    %29 = vector.load %arg6[%c0_12, %c0_13] : memref<1x96xf32, #tpu.memory_space<vmem>>, vector<1x96xf32>
    %30 = vector.broadcast %29 : vector<1x96xf32> to vector<16x96xf32>
    %31 = arith.addf %28, %30 : vector<16x96xf32>
    %32 = arith.truncf %31 : vector<16x96xf32> to vector<16x96xbf16>
    %c0_14 = arith.constant 0 : index
    %c0_15 = arith.constant 0 : index
    %33 = vector.load %arg7[%c0_14, %c0_15] : memref<16x96xbf16, #tpu.memory_space<vmem>>, vector<16x96xbf16>
    tpu.vector_store %arg7[%c0_14, %c0_15], %32 {strides = array<i32>} : memref<16x96xbf16, #tpu.memory_space<vmem>>, vector<16x96xbf16>,
    return
  }
  func.func @transform_0(%arg0: i32, %arg1: i32) -> (i32, i32) {
    %c0_i32 = arith.constant 0 : i32
    %c0_i32_0 = arith.constant 0 : i32
    return %arg0, %c0_i32 : i32, i32
  }
  func.func @transform_1(%arg0: i32, %arg1: i32) -> (i32, i32) {
    %c0_i32 = arith.constant 0 : i32
    %c0_i32_0 = arith.constant 0 : i32
    %c0_i32_1 = arith.constant 0 : i32
    return %c0_i32, %c0_i32_0 : i32, i32
  }
  func.func @transform_2(%arg0: i32, %arg1: i32) -> (i32, i32) {
    %c0_i32 = arith.constant 0 : i32
    %c0_i32_0 = arith.constant 0 : i32
    %c0_i32_1 = arith.constant 0 : i32
    return %c0_i32, %c0_i32_0 : i32, i32
  }
  func.func @transform_3(%arg0: i32, %arg1: i32) -> (i32, i32) {
    %c0_i32 = arith.constant 0 : i32
    %c0_i32_0 = arith.constant 0 : i32
    return %c0_i32, %arg1 : i32, i32
  }
  func.func @transform_4(%arg0: i32, %arg1: i32) -> (i32, i32) {
    %c0_i32 = arith.constant 0 : i32
    %c0_i32_0 = arith.constant 0 : i32
    return %c0_i32, %arg1 : i32, i32
  }
  func.func @transform_5(%arg0: i32, %arg1: i32) -> (i32, i32) {
    %c0_i32 = arith.constant 0 : i32
    return %arg0, %arg1 : i32, i32
  }
}

module attributes {stable_mosaic.version = 11 : i64} {
  func.func @_linear_kernel(%arg0: i32, %arg1: i32, %arg2: i32, %arg3: memref<2x16xbf16, #tpu.memory_space<vmem>>, %arg4: memref<16x64xbf16, #tpu.memory_space<vmem>>, %arg5: memref<2x64xbf16, #tpu.memory_space<vmem>>, %arg6: memref<2x64xf32, #tpu.memory_space<vmem>>) attributes {dimension_semantics = [#tpu.dimension_semantics<parallel>, #tpu.dimension_semantics<parallel>, #tpu.dimension_semantics<arbitrary>], iteration_bounds = array<i64: 1, 1, 1>, scalar_prefetch = 0 : i64, scratch_operands = 1 : i64, tpu.core_type = #tpu.core_type<tc>, window_params = [{transform_indices = @transform_0, window_bounds = array<i64: 2, 16>}, {transform_indices = @transform_1, window_bounds = array<i64: 16, 64>}, {transform_indices = @transform_2, window_bounds = array<i64: 2, 64>}]} {
    %c0_i32 = arith.constant 0 : i32
    %0 = arith.cmpi eq, %arg2, %c0_i32 : i32
    %1 = arith.extui %0 : i1 to i32
    %c0_i32_0 = arith.constant 0 : i32
    %2 = arith.cmpi ne, %1, %c0_i32_0 : i32
    scf.if %2 {
      %cst_10 = arith.constant 0.000000e+00 : f32
      %12 = vector.broadcast %cst_10 : f32 to vector<2x64xf32>
      %c0_11 = arith.constant 0 : index
      %c0_12 = arith.constant 0 : index
      %13 = vector.load %arg6[%c0_11, %c0_12] : memref<2x64xf32, #tpu.memory_space<vmem>>, vector<2x64xf32>
      tpu.vector_store %arg6[%c0_11, %c0_12], %12 {strides = array<i32>} : memref<2x64xf32, #tpu.memory_space<vmem>>, vector<2x64xf32>,
    } else {
    }
    %c0 = arith.constant 0 : index
    %c0_1 = arith.constant 0 : index
    %3 = vector.load %arg6[%c0, %c0_1] : memref<2x64xf32, #tpu.memory_space<vmem>>, vector<2x64xf32>
    %c0_2 = arith.constant 0 : index
    %c0_3 = arith.constant 0 : index
    %4 = vector.load %arg3[%c0_2, %c0_3] : memref<2x16xbf16, #tpu.memory_space<vmem>>, vector<2x16xbf16>
    %c0_4 = arith.constant 0 : index
    %c0_5 = arith.constant 0 : index
    %5 = vector.load %arg4[%c0_4, %c0_5] : memref<16x64xbf16, #tpu.memory_space<vmem>>, vector<16x64xbf16>
    %cst = arith.constant dense<0.000000e+00> : vector<2x64xf32>
    %6 = tpu.matmul %4, %5, %cst {dimension_numbers = #tpu.dot_dimension_numbers<[1], [0], [0], [1], [0, 0, 1, 1], [], []>} : vector<2x16xbf16>, vector<16x64xbf16>, vector<2x64xf32> -> vector<2x64xf32>
    %7 = arith.addf %3, %6 : vector<2x64xf32>
    %c0_6 = arith.constant 0 : index
    %c0_7 = arith.constant 0 : index
    %8 = vector.load %arg6[%c0_6, %c0_7] : memref<2x64xf32, #tpu.memory_space<vmem>>, vector<2x64xf32>
    tpu.vector_store %arg6[%c0_6, %c0_7], %7 {strides = array<i32>} : memref<2x64xf32, #tpu.memory_space<vmem>>, vector<2x64xf32>,
    %c0_i32_8 = arith.constant 0 : i32
    %9 = arith.cmpi eq, %arg2, %c0_i32_8 : i32
    %10 = arith.extui %9 : i1 to i32
    %c0_i32_9 = arith.constant 0 : i32
    %11 = arith.cmpi ne, %10, %c0_i32_9 : i32
    scf.if %11 {
      %c0_10 = arith.constant 0 : index
      %c0_11 = arith.constant 0 : index
      %12 = vector.load %arg6[%c0_10, %c0_11] : memref<2x64xf32, #tpu.memory_space<vmem>>, vector<2x64xf32>
      %13 = arith.truncf %12 : vector<2x64xf32> to vector<2x64xbf16>
      %c0_12 = arith.constant 0 : index
      %c0_13 = arith.constant 0 : index
      %14 = vector.load %arg5[%c0_12, %c0_13] : memref<2x64xbf16, #tpu.memory_space<vmem>>, vector<2x64xbf16>
      tpu.vector_store %arg5[%c0_12, %c0_13], %13 {strides = array<i32>} : memref<2x64xbf16, #tpu.memory_space<vmem>>, vector<2x64xbf16>,
    } else {
    }
    return
  }
  func.func @transform_0(%arg0: i32, %arg1: i32, %arg2: i32) -> (i32, i32) {
    %c0_i32 = arith.constant 0 : i32
    return %arg0, %arg2 : i32, i32
  }
  func.func @transform_1(%arg0: i32, %arg1: i32, %arg2: i32) -> (i32, i32) {
    %c0_i32 = arith.constant 0 : i32
    return %arg2, %arg1 : i32, i32
  }
  func.func @transform_2(%arg0: i32, %arg1: i32, %arg2: i32) -> (i32, i32) {
    %c0_i32 = arith.constant 0 : i32
    return %arg0, %arg1 : i32, i32
  }
}

module attributes {stable_mosaic.version = 11 : i64} {
  func.func @_ln_linear_kernel(%arg0: i32, %arg1: i32, %arg2: memref<2x32xbf16, #tpu.memory_space<vmem>>, %arg3: memref<1x32xf32, #tpu.memory_space<vmem>>, %arg4: memref<1x32xf32, #tpu.memory_space<vmem>>, %arg5: memref<32x96xbf16, #tpu.memory_space<vmem>>, %arg6: memref<1x96xf32, #tpu.memory_space<vmem>>, %arg7: memref<2x96xbf16, #tpu.memory_space<vmem>>) attributes {dimension_semantics = [#tpu.dimension_semantics<parallel>, #tpu.dimension_semantics<parallel>], iteration_bounds = array<i64: 1, 1>, scalar_prefetch = 0 : i64, scratch_operands = 0 : i64, tpu.core_type = #tpu.core_type<tc>, window_params = [{transform_indices = @transform_0, window_bounds = array<i64: 2, 32>}, {pipeline_mode = #tpu.pipeline_mode<synchronous>, transform_indices = @transform_1, window_bounds = array<i64: 1, 32>}, {pipeline_mode = #tpu.pipeline_mode<synchronous>, transform_indices = @transform_2, window_bounds = array<i64: 1, 32>}, {transform_indices = @transform_3, window_bounds = array<i64: 32, 96>}, {transform_indices = @transform_4, window_bounds = array<i64: 1, 96>}, {transform_indices = @transform_5, window_bounds = array<i64: 2, 96>}]} {
    %c0 = arith.constant 0 : index
    %c0_0 = arith.constant 0 : index
    %0 = vector.load %arg2[%c0, %c0_0] : memref<2x32xbf16, #tpu.memory_space<vmem>>, vector<2x32xbf16>
    %1 = arith.extf %0 : vector<2x32xbf16> to vector<2x32xf32>
    %cst = arith.constant dense<0.000000e+00> : vector<2xf32>
    %2 = vector.multi_reduction <add>, %1, %cst [1] : vector<2x32xf32> to vector<2xf32>
    %3 = vector.shape_cast %2 : vector<2xf32> to vector<2x1xf32>
    %cst_1 = arith.constant 3.200000e+01 : f32
    %4 = vector.broadcast %cst_1 : f32 to vector<2x1xf32>
    %5 = arith.divf %3, %4 : vector<2x1xf32>
    %6 = vector.broadcast %5 : vector<2x1xf32> to vector<2x32xf32>
    %7 = arith.subf %1, %6 : vector<2x32xf32>
    %8 = arith.mulf %7, %7 : vector<2x32xf32>
    %cst_2 = arith.constant dense<0.000000e+00> : vector<2xf32>
    %9 = vector.multi_reduction <add>, %8, %cst_2 [1] : vector<2x32xf32> to vector<2xf32>
    %10 = vector.shape_cast %9 : vector<2xf32> to vector<2x1xf32>
    %cst_3 = arith.constant 3.200000e+01 : f32
    %11 = vector.broadcast %cst_3 : f32 to vector<2x1xf32>
    %12 = arith.divf %10, %11 : vector<2x1xf32>
    %13 = vector.broadcast %5 : vector<2x1xf32> to vector<2x32xf32>
    %14 = arith.subf %1, %13 : vector<2x32xf32>
    %cst_4 = arith.constant 9.99999974E-6 : f32
    %15 = vector.broadcast %cst_4 : f32 to vector<2x1xf32>
    %16 = arith.addf %12, %15 : vector<2x1xf32>
    %17 = math.rsqrt %16 : vector<2x1xf32>
    %18 = vector.broadcast %17 : vector<2x1xf32> to vector<2x32xf32>
    %19 = arith.mulf %14, %18 : vector<2x32xf32>
    %c0_5 = arith.constant 0 : index
    %c0_6 = arith.constant 0 : index
    %20 = vector.load %arg3[%c0_5, %c0_6] : memref<1x32xf32, #tpu.memory_space<vmem>>, vector<1x32xf32>
    %21 = vector.broadcast %20 : vector<1x32xf32> to vector<2x32xf32>
    %22 = arith.mulf %19, %21 : vector<2x32xf32>
    %c0_7 = arith.constant 0 : index
    %c0_8 = arith.constant 0 : index
    %23 = vector.load %arg4[%c0_7, %c0_8] : memref<1x32xf32, #tpu.memory_space<vmem>>, vector<1x32xf32>
    %24 = vector.broadcast %23 : vector<1x32xf32> to vector<2x32xf32>
    %25 = arith.addf %22, %24 : vector<2x32xf32>
    %26 = arith.truncf %25 : vector<2x32xf32> to vector<2x32xbf16>
    %c0_9 = arith.constant 0 : index
    %c0_10 = arith.constant 0 : index
    %27 = vector.load %arg5[%c0_9, %c0_10] : memref<32x96xbf16, #tpu.memory_space<vmem>>, vector<32x96xbf16>
    %cst_11 = arith.constant dense<0.000000e+00> : vector<2x96xf32>
    %28 = tpu.matmul %26, %27, %cst_11 {dimension_numbers = #tpu.dot_dimension_numbers<[1], [0], [0], [1], [0, 0, 1, 1], [], []>} : vector<2x32xbf16>, vector<32x96xbf16>, vector<2x96xf32> -> vector<2x96xf32>
    %c0_12 = arith.constant 0 : index
    %c0_13 = arith.constant 0 : index
    %29 = vector.load %arg6[%c0_12, %c0_13] : memref<1x96xf32, #tpu.memory_space<vmem>>, vector<1x96xf32>
    %30 = vector.broadcast %29 : vector<1x96xf32> to vector<2x96xf32>
    %31 = arith.addf %28, %30 : vector<2x96xf32>
    %32 = arith.truncf %31 : vector<2x96xf32> to vector<2x96xbf16>
    %c0_14 = arith.constant 0 : index
    %c0_15 = arith.constant 0 : index
    %33 = vector.load %arg7[%c0_14, %c0_15] : memref<2x96xbf16, #tpu.memory_space<vmem>>, vector<2x96xbf16>
    tpu.vector_store %arg7[%c0_14, %c0_15], %32 {strides = array<i32>} : memref<2x96xbf16, #tpu.memory_space<vmem>>, vector<2x96xbf16>,
    return
  }
  func.func @transform_0(%arg0: i32, %arg1: i32) -> (i32, i32) {
    %c0_i32 = arith.constant 0 : i32
    %c0_i32_0 = arith.constant 0 : i32
    return %arg0, %c0_i32 : i32, i32
  }
  func.func @transform_1(%arg0: i32, %arg1: i32) -> (i32, i32) {
    %c0_i32 = arith.constant 0 : i32
    %c0_i32_0 = arith.constant 0 : i32
    %c0_i32_1 = arith.constant 0 : i32
    return %c0_i32, %c0_i32_0 : i32, i32
  }
  func.func @transform_2(%arg0: i32, %arg1: i32) -> (i32, i32) {
    %c0_i32 = arith.constant 0 : i32
    %c0_i32_0 = arith.constant 0 : i32
    %c0_i32_1 = arith.constant 0 : i32
    return %c0_i32, %c0_i32_0 : i32, i32
  }
  func.func @transform_3(%arg0: i32, %arg1: i32) -> (i32, i32) {
    %c0_i32 = arith.constant 0 : i32
    %c0_i32_0 = arith.constant 0 : i32
    return %c0_i32, %arg1 : i32, i32
  }
  func.func @transform_4(%arg0: i32, %arg1: i32) -> (i32, i32) {
    %c0_i32 = arith.constant 0 : i32
    %c0_i32_0 = arith.constant 0 : i32
    return %c0_i32, %arg1 : i32, i32
  }
  func.func @transform_5(%arg0: i32, %arg1: i32) -> (i32, i32) {
    %c0_i32 = arith.constant 0 : i32
    return %arg0, %arg1 : i32, i32
  }
}

module attributes {stable_mosaic.version = 11 : i64} {
  func.func @_attention_kernel(%arg0: i32, %arg1: memref<1x8x96xbf16, #tpu.memory_space<vmem>>, %arg2: memref<1x1x96xbf16, #tpu.memory_space<vmem>>, %arg3: memref<1x8x32xbf16, #tpu.memory_space<vmem>>) attributes {dimension_semantics = [#tpu.dimension_semantics<parallel>], iteration_bounds = array<i64: 2>, scalar_prefetch = 0 : i64, scratch_operands = 0 : i64, tpu.core_type = #tpu.core_type<tc>, window_params = [{transform_indices = @transform_0, window_bounds = array<i64: 1, 8, 96>}, {transform_indices = @transform_1, window_bounds = array<i64: 1, 1, 96>}, {transform_indices = @transform_2, window_bounds = array<i64: 1, 8, 32>}]} {
    %c0 = arith.constant 0 : index
    %c0_0 = arith.constant 0 : index
    %c0_1 = arith.constant 0 : index
    %0 = vector.load %arg1[%c0, %c0_0, %c0_1] : memref<1x8x96xbf16, #tpu.memory_space<vmem>>, vector<1x8x96xbf16>
    %1 = vector.shape_cast %0 : vector<1x8x96xbf16> to vector<8x96xbf16>
    %2 = vector.extract_strided_slice %1 {offsets = [0, 0], sizes = [8, 32], strides = [1, 1]} : vector<8x96xbf16> to vector<8x32xbf16>
    %3 = vector.extract_strided_slice %1 {offsets = [0, 32], sizes = [8, 32], strides = [1, 1]} : vector<8x96xbf16> to vector<8x32xbf16>
    %4 = vector.extract_strided_slice %1 {offsets = [0, 64], sizes = [8, 32], strides = [1, 1]} : vector<8x96xbf16> to vector<8x32xbf16>
    %c0_2 = arith.constant 0 : index
    %c0_3 = arith.constant 0 : index
    %c0_4 = arith.constant 0 : index
    %5 = vector.load %arg2[%c0_2, %c0_3, %c0_4] : memref<1x1x96xbf16, #tpu.memory_space<vmem>>, vector<1x1x96xbf16>
    %6 = vector.shape_cast %5 : vector<1x1x96xbf16> to vector<1x96xbf16>
    %7 = vector.extract_strided_slice %6 {offsets = [0, 32], sizes = [1, 32], strides = [1, 1]} : vector<1x96xbf16> to vector<1x32xbf16>
    %8 = vector.extract_strided_slice %6 {offsets = [0, 64], sizes = [1, 32], strides = [1, 1]} : vector<1x96xbf16> to vector<1x32xbf16>
    %9 = tpu.iota {dimensions = array<i32: 0>} : vector<8x8xi32>
    %10 = tpu.iota {dimensions = array<i32: 1>} : vector<8x8xi32>
    %11 = arith.cmpi sle, %10, %9 : vector<8x8xi32>
    %12 = vector.extract_strided_slice %2 {offsets = [0, 0], sizes = [8, 16], strides = [1, 1]} : vector<8x32xbf16> to vector<8x16xbf16>
    %13 = vector.extract_strided_slice %3 {offsets = [0, 0], sizes = [8, 16], strides = [1, 1]} : vector<8x32xbf16> to vector<8x16xbf16>
    %14 = vector.extract_strided_slice %4 {offsets = [0, 0], sizes = [8, 16], strides = [1, 1]} : vector<8x32xbf16> to vector<8x16xbf16>
    %15 = tpu.transpose %13, [1, 0] : vector<8x16xbf16> -> vector<16x8xbf16>
    %cst = arith.constant dense<0.000000e+00> : vector<8x8xf32>
    %16 = tpu.matmul %12, %15, %cst {dimension_numbers = #tpu.dot_dimension_numbers<[1], [0], [0], [1], [0, 0, 1, 1], [], []>} : vector<8x16xbf16>, vector<16x8xbf16>, vector<8x8xf32> -> vector<8x8xf32>
    %cst_5 = arith.constant 2.500000e-01 : f32
    %17 = vector.broadcast %cst_5 : f32 to vector<8x8xf32>
    %18 = arith.mulf %16, %17 : vector<8x8xf32>
    %cst_6 = arith.constant -1.000000e+30 : f32
    %19 = vector.broadcast %cst_6 : f32 to vector<8x8xf32>
    %20 = arith.select %11, %18, %19 : vector<8x8xi1>, vector<8x8xf32>
    %21 = vector.extract_strided_slice %7 {offsets = [0, 0], sizes = [1, 16], strides = [1, 1]} : vector<1x32xbf16> to vector<1x16xbf16>
    %22 = tpu.transpose %21, [1, 0] : vector<1x16xbf16> -> vector<16x1xbf16>
    %cst_7 = arith.constant dense<0.000000e+00> : vector<8x1xf32>
    %23 = tpu.matmul %12, %22, %cst_7 {dimension_numbers = #tpu.dot_dimension_numbers<[1], [0], [0], [1], [0, 0, 1, 1], [], []>} : vector<8x16xbf16>, vector<16x1xbf16>, vector<8x1xf32> -> vector<8x1xf32>
    %cst_8 = arith.constant 2.500000e-01 : f32
    %24 = vector.broadcast %cst_8 : f32 to vector<8x1xf32>
    %25 = arith.mulf %23, %24 : vector<8x1xf32>
    %cst_9 = arith.constant dense<0xFF800000> : vector<8xf32>
    %26 = vector.multi_reduction <maximumf>, %20, %cst_9 [1] : vector<8x8xf32> to vector<8xf32>
    %27 = vector.shape_cast %26 : vector<8xf32> to vector<8x1xf32>
    %28 = arith.maximumf %27, %25 : vector<8x1xf32>
    %29 = vector.broadcast %28 : vector<8x1xf32> to vector<8x8xf32>
    %30 = arith.subf %20, %29 : vector<8x8xf32>
    %31 = math.exp %30 : vector<8x8xf32>
    %32 = arith.subf %25, %28 : vector<8x1xf32>
    %33 = math.exp %32 : vector<8x1xf32>
    %cst_10 = arith.constant dense<0.000000e+00> : vector<8xf32>
    %34 = vector.multi_reduction <add>, %31, %cst_10 [1] : vector<8x8xf32> to vector<8xf32>
    %35 = vector.shape_cast %34 : vector<8xf32> to vector<8x1xf32>
    %36 = arith.addf %35, %33 : vector<8x1xf32>
    %37 = tpu.reciprocal %36 {approx = true} : vector<8x1xf32> -> vector<8x1xf32>
    %38 = vector.broadcast %37 : vector<8x1xf32> to vector<8x8xf32>
    %39 = arith.mulf %31, %38 : vector<8x8xf32>
    %40 = arith.truncf %39 : vector<8x8xf32> to vector<8x8xbf16>
    %cst_11 = arith.constant dense<0.000000e+00> : vector<8x16xf32>
    %41 = tpu.matmul %40, %14, %cst_11 {dimension_numbers = #tpu.dot_dimension_numbers<[1], [0], [0], [1], [0, 0, 1, 1], [], []>} : vector<8x8xbf16>, vector<8x16xbf16>, vector<8x16xf32> -> vector<8x16xf32>
    %42 = arith.mulf %33, %37 : vector<8x1xf32>
    %43 = vector.extract_strided_slice %8 {offsets = [0, 0], sizes = [1, 16], strides = [1, 1]} : vector<1x32xbf16> to vector<1x16xbf16>
    %44 = arith.extf %43 : vector<1x16xbf16> to vector<1x16xf32>
    %45 = vector.broadcast %42 : vector<8x1xf32> to vector<8x16xf32>
    %46 = vector.broadcast %44 : vector<1x16xf32> to vector<8x16xf32>
    %47 = arith.mulf %45, %46 : vector<8x16xf32>
    %48 = arith.addf %41, %47 : vector<8x16xf32>
    %49 = vector.extract_strided_slice %2 {offsets = [0, 16], sizes = [8, 16], strides = [1, 1]} : vector<8x32xbf16> to vector<8x16xbf16>
    %50 = vector.extract_strided_slice %3 {offsets = [0, 16], sizes = [8, 16], strides = [1, 1]} : vector<8x32xbf16> to vector<8x16xbf16>
    %51 = vector.extract_strided_slice %4 {offsets = [0, 16], sizes = [8, 16], strides = [1, 1]} : vector<8x32xbf16> to vector<8x16xbf16>
    %52 = tpu.transpose %50, [1, 0] : vector<8x16xbf16> -> vector<16x8xbf16>
    %cst_12 = arith.constant dense<0.000000e+00> : vector<8x8xf32>
    %53 = tpu.matmul %49, %52, %cst_12 {dimension_numbers = #tpu.dot_dimension_numbers<[1], [0], [0], [1], [0, 0, 1, 1], [], []>} : vector<8x16xbf16>, vector<16x8xbf16>, vector<8x8xf32> -> vector<8x8xf32>
    %cst_13 = arith.constant 2.500000e-01 : f32
    %54 = vector.broadcast %cst_13 : f32 to vector<8x8xf32>
    %55 = arith.mulf %53, %54 : vector<8x8xf32>
    %cst_14 = arith.constant -1.000000e+30 : f32
    %56 = vector.broadcast %cst_14 : f32 to vector<8x8xf32>
    %57 = arith.select %11, %55, %56 : vector<8x8xi1>, vector<8x8xf32>
    %58 = vector.extract_strided_slice %7 {offsets = [0, 16], sizes = [1, 16], strides = [1, 1]} : vector<1x32xbf16> to vector<1x16xbf16>
    %59 = tpu.transpose %58, [1, 0] : vector<1x16xbf16> -> vector<16x1xbf16>
    %cst_15 = arith.constant dense<0.000000e+00> : vector<8x1xf32>
    %60 = tpu.matmul %49, %59, %cst_15 {dimension_numbers = #tpu.dot_dimension_numbers<[1], [0], [0], [1], [0, 0, 1, 1], [], []>} : vector<8x16xbf16>, vector<16x1xbf16>, vector<8x1xf32> -> vector<8x1xf32>
    %cst_16 = arith.constant 2.500000e-01 : f32
    %61 = vector.broadcast %cst_16 : f32 to vector<8x1xf32>
    %62 = arith.mulf %60, %61 : vector<8x1xf32>
    %cst_17 = arith.constant dense<0xFF800000> : vector<8xf32>
    %63 = vector.multi_reduction <maximumf>, %57, %cst_17 [1] : vector<8x8xf32> to vector<8xf32>
    %64 = vector.shape_cast %63 : vector<8xf32> to vector<8x1xf32>
    %65 = arith.maximumf %64, %62 : vector<8x1xf32>
    %66 = vector.broadcast %65 : vector<8x1xf32> to vector<8x8xf32>
    %67 = arith.subf %57, %66 : vector<8x8xf32>
    %68 = math.exp %67 : vector<8x8xf32>
    %69 = arith.subf %62, %65 : vector<8x1xf32>
    %70 = math.exp %69 : vector<8x1xf32>
    %cst_18 = arith.constant dense<0.000000e+00> : vector<8xf32>
    %71 = vector.multi_reduction <add>, %68, %cst_18 [1] : vector<8x8xf32> to vector<8xf32>
    %72 = vector.shape_cast %71 : vector<8xf32> to vector<8x1xf32>
    %73 = arith.addf %72, %70 : vector<8x1xf32>
    %74 = tpu.reciprocal %73 {approx = true} : vector<8x1xf32> -> vector<8x1xf32>
    %75 = vector.broadcast %74 : vector<8x1xf32> to vector<8x8xf32>
    %76 = arith.mulf %68, %75 : vector<8x8xf32>
    %77 = arith.truncf %76 : vector<8x8xf32> to vector<8x8xbf16>
    %cst_19 = arith.constant dense<0.000000e+00> : vector<8x16xf32>
    %78 = tpu.matmul %77, %51, %cst_19 {dimension_numbers = #tpu.dot_dimension_numbers<[1], [0], [0], [1], [0, 0, 1, 1], [], []>} : vector<8x8xbf16>, vector<8x16xbf16>, vector<8x16xf32> -> vector<8x16xf32>
    %79 = arith.mulf %70, %74 : vector<8x1xf32>
    %80 = vector.extract_strided_slice %8 {offsets = [0, 16], sizes = [1, 16], strides = [1, 1]} : vector<1x32xbf16> to vector<1x16xbf16>
    %81 = arith.extf %80 : vector<1x16xbf16> to vector<1x16xf32>
    %82 = vector.broadcast %79 : vector<8x1xf32> to vector<8x16xf32>
    %83 = vector.broadcast %81 : vector<1x16xf32> to vector<8x16xf32>
    %84 = arith.mulf %82, %83 : vector<8x16xf32>
    %85 = arith.addf %78, %84 : vector<8x16xf32>
    %86 = tpu.concatenate %48, %85 in 1 : vector<8x16xf32>, vector<8x16xf32> -> vector<8x32xf32>
    %87 = arith.truncf %86 : vector<8x32xf32> to vector<8x32xbf16>
    %c0_20 = arith.constant 0 : index
    %c0_21 = arith.constant 0 : index
    %c0_22 = arith.constant 0 : index
    %88 = vector.load %arg3[%c0_20, %c0_21, %c0_22] : memref<1x8x32xbf16, #tpu.memory_space<vmem>>, vector<1x8x32xbf16>
    %89 = vector.shape_cast %88 : vector<1x8x32xbf16> to vector<8x32xbf16>
    %90 = vector.shape_cast %87 : vector<8x32xbf16> to vector<1x8x32xbf16>
    tpu.vector_store %arg3[%c0_20, %c0_21, %c0_22], %90 {strides = array<i32>} : memref<1x8x32xbf16, #tpu.memory_space<vmem>>, vector<1x8x32xbf16>,
    return
  }
  func.func @transform_0(%arg0: i32) -> (i32, i32, i32) {
    %c0_i32 = arith.constant 0 : i32
    %c0_i32_0 = arith.constant 0 : i32
    %c0_i32_1 = arith.constant 0 : i32
    return %arg0, %c0_i32, %c0_i32_0 : i32, i32, i32
  }
  func.func @transform_1(%arg0: i32) -> (i32, i32, i32) {
    %c0_i32 = arith.constant 0 : i32
    %c0_i32_0 = arith.constant 0 : i32
    %c0_i32_1 = arith.constant 0 : i32
    return %arg0, %c0_i32, %c0_i32_0 : i32, i32, i32
  }
  func.func @transform_2(%arg0: i32) -> (i32, i32, i32) {
    %c0_i32 = arith.constant 0 : i32
    %c0_i32_0 = arith.constant 0 : i32
    %c0_i32_1 = arith.constant 0 : i32
    return %arg0, %c0_i32, %c0_i32_0 : i32, i32, i32
  }
}

module attributes {stable_mosaic.version = 11 : i64} {
  func.func @_mlp_kernel(%arg0: i32, %arg1: i32, %arg2: memref<16x32xbf16, #tpu.memory_space<vmem>>, %arg3: memref<1x32xf32, #tpu.memory_space<vmem>>, %arg4: memref<1x32xf32, #tpu.memory_space<vmem>>, %arg5: memref<32x128xbf16, #tpu.memory_space<vmem>>, %arg6: memref<1x128xf32, #tpu.memory_space<vmem>>, %arg7: memref<128x32xbf16, #tpu.memory_space<vmem>>, %arg8: memref<1x32xf32, #tpu.memory_space<vmem>>, %arg9: memref<16x32xbf16, #tpu.memory_space<vmem>>, %arg10: memref<16x32xbf16, #tpu.memory_space<vmem>>, %arg11: memref<16x32xf32, #tpu.memory_space<vmem>>) attributes {dimension_semantics = [#tpu.dimension_semantics<parallel>, #tpu.dimension_semantics<arbitrary>], iteration_bounds = array<i64: 1, 1>, scalar_prefetch = 0 : i64, scratch_operands = 2 : i64, tpu.core_type = #tpu.core_type<tc>, window_params = [{transform_indices = @transform_0, window_bounds = array<i64: 16, 32>}, {pipeline_mode = #tpu.pipeline_mode<synchronous>, transform_indices = @transform_1, window_bounds = array<i64: 1, 32>}, {pipeline_mode = #tpu.pipeline_mode<synchronous>, transform_indices = @transform_2, window_bounds = array<i64: 1, 32>}, {transform_indices = @transform_3, window_bounds = array<i64: 32, 128>}, {transform_indices = @transform_4, window_bounds = array<i64: 1, 128>}, {transform_indices = @transform_5, window_bounds = array<i64: 128, 32>}, {pipeline_mode = #tpu.pipeline_mode<synchronous>, transform_indices = @transform_6, window_bounds = array<i64: 1, 32>}, {transform_indices = @transform_7, window_bounds = array<i64: 16, 32>}]} {
    %c0_i32 = arith.constant 0 : i32
    %0 = arith.cmpi eq, %arg1, %c0_i32 : i32
    %1 = arith.extui %0 : i1 to i32
    %c0_i32_0 = arith.constant 0 : i32
    %2 = arith.cmpi ne, %1, %c0_i32_0 : i32
    scf.if %2 {
      %c0_19 = arith.constant 0 : index
      %c0_20 = arith.constant 0 : index
      %31 = vector.load %arg2[%c0_19, %c0_20] : memref<16x32xbf16, #tpu.memory_space<vmem>>, vector<16x32xbf16>
      %32 = arith.extf %31 : vector<16x32xbf16> to vector<16x32xf32>
      %cst_21 = arith.constant dense<0.000000e+00> : vector<16xf32>
      %33 = vector.multi_reduction <add>, %32, %cst_21 [1] : vector<16x32xf32> to vector<16xf32>
      %34 = vector.shape_cast %33 : vector<16xf32> to vector<16x1xf32>
      %cst_22 = arith.constant 3.200000e+01 : f32
      %35 = vector.broadcast %cst_22 : f32 to vector<16x1xf32>
      %36 = arith.divf %34, %35 : vector<16x1xf32>
      %37 = vector.broadcast %36 : vector<16x1xf32> to vector<16x32xf32>
      %38 = arith.subf %32, %37 : vector<16x32xf32>
      %39 = arith.mulf %38, %38 : vector<16x32xf32>
      %cst_23 = arith.constant dense<0.000000e+00> : vector<16xf32>
      %40 = vector.multi_reduction <add>, %39, %cst_23 [1] : vector<16x32xf32> to vector<16xf32>
      %41 = vector.shape_cast %40 : vector<16xf32> to vector<16x1xf32>
      %cst_24 = arith.constant 3.200000e+01 : f32
      %42 = vector.broadcast %cst_24 : f32 to vector<16x1xf32>
      %43 = arith.divf %41, %42 : vector<16x1xf32>
      %44 = vector.broadcast %36 : vector<16x1xf32> to vector<16x32xf32>
      %45 = arith.subf %32, %44 : vector<16x32xf32>
      %cst_25 = arith.constant 9.99999974E-6 : f32
      %46 = vector.broadcast %cst_25 : f32 to vector<16x1xf32>
      %47 = arith.addf %43, %46 : vector<16x1xf32>
      %48 = math.rsqrt %47 : vector<16x1xf32>
      %49 = vector.broadcast %48 : vector<16x1xf32> to vector<16x32xf32>
      %50 = arith.mulf %45, %49 : vector<16x32xf32>
      %c0_26 = arith.constant 0 : index
      %c0_27 = arith.constant 0 : index
      %51 = vector.load %arg3[%c0_26, %c0_27] : memref<1x32xf32, #tpu.memory_space<vmem>>, vector<1x32xf32>
      %52 = vector.broadcast %51 : vector<1x32xf32> to vector<16x32xf32>
      %53 = arith.mulf %50, %52 : vector<16x32xf32>
      %c0_28 = arith.constant 0 : index
      %c0_29 = arith.constant 0 : index
      %54 = vector.load %arg4[%c0_28, %c0_29] : memref<1x32xf32, #tpu.memory_space<vmem>>, vector<1x32xf32>
      %55 = vector.broadcast %54 : vector<1x32xf32> to vector<16x32xf32>
      %56 = arith.addf %53, %55 : vector<16x32xf32>
      %57 = arith.truncf %56 : vector<16x32xf32> to vector<16x32xbf16>
      %c0_30 = arith.constant 0 : index
      %c0_31 = arith.constant 0 : index
      %58 = vector.load %arg10[%c0_30, %c0_31] : memref<16x32xbf16, #tpu.memory_space<vmem>>, vector<16x32xbf16>
      tpu.vector_store %arg10[%c0_30, %c0_31], %57 {strides = array<i32>} : memref<16x32xbf16, #tpu.memory_space<vmem>>, vector<16x32xbf16>,
      %cst_32 = arith.constant 0.000000e+00 : f32
      %59 = vector.broadcast %cst_32 : f32 to vector<16x32xf32>
      %c0_33 = arith.constant 0 : index
      %c0_34 = arith.constant 0 : index
      %60 = vector.load %arg11[%c0_33, %c0_34] : memref<16x32xf32, #tpu.memory_space<vmem>>, vector<16x32xf32>
      tpu.vector_store %arg11[%c0_33, %c0_34], %59 {strides = array<i32>} : memref<16x32xf32, #tpu.memory_space<vmem>>, vector<16x32xf32>,
    } else {
    }
    %c0 = arith.constant 0 : index
    %c0_1 = arith.constant 0 : index
    %3 = vector.load %arg10[%c0, %c0_1] : memref<16x32xbf16, #tpu.memory_space<vmem>>, vector<16x32xbf16>
    %c0_2 = arith.constant 0 : index
    %c0_3 = arith.constant 0 : index
    %4 = vector.load %arg5[%c0_2, %c0_3] : memref<32x128xbf16, #tpu.memory_space<vmem>>, vector<32x128xbf16>
    %cst = arith.constant dense<0.000000e+00> : vector<16x128xf32>
    %5 = tpu.matmul %3, %4, %cst {dimension_numbers = #tpu.dot_dimension_numbers<[1], [0], [0], [1], [0, 0, 1, 1], [], []>} : vector<16x32xbf16>, vector<32x128xbf16>, vector<16x128xf32> -> vector<16x128xf32>
    %c0_4 = arith.constant 0 : index
    %c0_5 = arith.constant 0 : index
    %6 = vector.load %arg6[%c0_4, %c0_5] : memref<1x128xf32, #tpu.memory_space<vmem>>, vector<1x128xf32>
    %7 = vector.broadcast %6 : vector<1x128xf32> to vector<16x128xf32>
    %8 = arith.addf %5, %7 : vector<16x128xf32>
    %9 = arith.mulf %8, %8 : vector<16x128xf32>
    %10 = arith.mulf %8, %9 : vector<16x128xf32>
    %cst_6 = arith.constant 4.471500e-02 : f32
    %11 = vector.broadcast %cst_6 : f32 to vector<16x128xf32>
    %12 = arith.mulf %11, %10 : vector<16x128xf32>
    %13 = arith.addf %8, %12 : vector<16x128xf32>
    %cst_7 = arith.constant 0.797884583 : f32
    %14 = vector.broadcast %cst_7 : f32 to vector<16x128xf32>
    %15 = arith.mulf %14, %13 : vector<16x128xf32>
    %16 = math.tanh %15 : vector<16x128xf32>
    %cst_8 = arith.constant 1.000000e+00 : f32
    %17 = vector.broadcast %cst_8 : f32 to vector<16x128xf32>
    %18 = arith.addf %17, %16 : vector<16x128xf32>
    %cst_9 = arith.constant 5.000000e-01 : f32
    %19 = vector.broadcast %cst_9 : f32 to vector<16x128xf32>
    %20 = arith.mulf %19, %18 : vector<16x128xf32>
    %21 = arith.mulf %8, %20 : vector<16x128xf32>
    %c0_10 = arith.constant 0 : index
    %c0_11 = arith.constant 0 : index
    %22 = vector.load %arg11[%c0_10, %c0_11] : memref<16x32xf32, #tpu.memory_space<vmem>>, vector<16x32xf32>
    %23 = arith.truncf %21 : vector<16x128xf32> to vector<16x128xbf16>
    %c0_12 = arith.constant 0 : index
    %c0_13 = arith.constant 0 : index
    %24 = vector.load %arg7[%c0_12, %c0_13] : memref<128x32xbf16, #tpu.memory_space<vmem>>, vector<128x32xbf16>
    %cst_14 = arith.constant dense<0.000000e+00> : vector<16x32xf32>
    %25 = tpu.matmul %23, %24, %cst_14 {dimension_numbers = #tpu.dot_dimension_numbers<[1], [0], [0], [1], [0, 0, 1, 1], [], []>} : vector<16x128xbf16>, vector<128x32xbf16>, vector<16x32xf32> -> vector<16x32xf32>
    %26 = arith.addf %22, %25 : vector<16x32xf32>
    %c0_15 = arith.constant 0 : index
    %c0_16 = arith.constant 0 : index
    %27 = vector.load %arg11[%c0_15, %c0_16] : memref<16x32xf32, #tpu.memory_space<vmem>>, vector<16x32xf32>
    tpu.vector_store %arg11[%c0_15, %c0_16], %26 {strides = array<i32>} : memref<16x32xf32, #tpu.memory_space<vmem>>, vector<16x32xf32>,
    %c0_i32_17 = arith.constant 0 : i32
    %28 = arith.cmpi eq, %arg1, %c0_i32_17 : i32
    %29 = arith.extui %28 : i1 to i32
    %c0_i32_18 = arith.constant 0 : i32
    %30 = arith.cmpi ne, %29, %c0_i32_18 : i32
    scf.if %30 {
      %c0_19 = arith.constant 0 : index
      %c0_20 = arith.constant 0 : index
      %31 = vector.load %arg11[%c0_19, %c0_20] : memref<16x32xf32, #tpu.memory_space<vmem>>, vector<16x32xf32>
      %c0_21 = arith.constant 0 : index
      %c0_22 = arith.constant 0 : index
      %32 = vector.load %arg8[%c0_21, %c0_22] : memref<1x32xf32, #tpu.memory_space<vmem>>, vector<1x32xf32>
      %33 = vector.broadcast %32 : vector<1x32xf32> to vector<16x32xf32>
      %34 = arith.addf %31, %33 : vector<16x32xf32>
      %c0_23 = arith.constant 0 : index
      %c0_24 = arith.constant 0 : index
      %35 = vector.load %arg2[%c0_23, %c0_24] : memref<16x32xbf16, #tpu.memory_space<vmem>>, vector<16x32xbf16>
      %36 = arith.extf %35 : vector<16x32xbf16> to vector<16x32xf32>
      %37 = arith.addf %34, %36 : vector<16x32xf32>
      %38 = arith.truncf %37 : vector<16x32xf32> to vector<16x32xbf16>
      %c0_25 = arith.constant 0 : index
      %c0_26 = arith.constant 0 : index
      %39 = vector.load %arg9[%c0_25, %c0_26] : memref<16x32xbf16, #tpu.memory_space<vmem>>, vector<16x32xbf16>
      tpu.vector_store %arg9[%c0_25, %c0_26], %38 {strides = array<i32>} : memref<16x32xbf16, #tpu.memory_space<vmem>>, vector<16x32xbf16>,
    } else {
    }
    return
  }
  func.func @transform_0(%arg0: i32, %arg1: i32) -> (i32, i32) {
    %c0_i32 = arith.constant 0 : i32
    %c0_i32_0 = arith.constant 0 : i32
    return %arg0, %c0_i32 : i32, i32
  }
  func.func @transform_1(%arg0: i32, %arg1: i32) -> (i32, i32) {
    %c0_i32 = arith.constant 0 : i32
    %c0_i32_0 = arith.constant 0 : i32
    %c0_i32_1 = arith.constant 0 : i32
    return %c0_i32, %c0_i32_0 : i32, i32
  }
  func.func @transform_2(%arg0: i32, %arg1: i32) -> (i32, i32) {
    %c0_i32 = arith.constant 0 : i32
    %c0_i32_0 = arith.constant 0 : i32
    %c0_i32_1 = arith.constant 0 : i32
    return %c0_i32, %c0_i32_0 : i32, i32
  }
  func.func @transform_3(%arg0: i32, %arg1: i32) -> (i32, i32) {
    %c0_i32 = arith.constant 0 : i32
    %c0_i32_0 = arith.constant 0 : i32
    return %c0_i32, %arg1 : i32, i32
  }
  func.func @transform_4(%arg0: i32, %arg1: i32) -> (i32, i32) {
    %c0_i32 = arith.constant 0 : i32
    %c0_i32_0 = arith.constant 0 : i32
    return %c0_i32, %arg1 : i32, i32
  }
  func.func @transform_5(%arg0: i32, %arg1: i32) -> (i32, i32) {
    %c0_i32 = arith.constant 0 : i32
    %c0_i32_0 = arith.constant 0 : i32
    return %arg1, %c0_i32 : i32, i32
  }
  func.func @transform_6(%arg0: i32, %arg1: i32) -> (i32, i32) {
    %c0_i32 = arith.constant 0 : i32
    %c0_i32_0 = arith.constant 0 : i32
    %c0_i32_1 = arith.constant 0 : i32
    return %c0_i32, %c0_i32_0 : i32, i32
  }
  func.func @transform_7(%arg0: i32, %arg1: i32) -> (i32, i32) {
    %c0_i32 = arith.constant 0 : i32
    %c0_i32_0 = arith.constant 0 : i32
    return %arg0, %c0_i32 : i32, i32
  }
}

module attributes {stable_mosaic.version = 11 : i64} {
  func.func @_ln_linear_kernel(%arg0: i32, %arg1: i32, %arg2: memref<16x32xbf16, #tpu.memory_space<vmem>>, %arg3: memref<1x32xf32, #tpu.memory_space<vmem>>, %arg4: memref<1x32xf32, #tpu.memory_space<vmem>>, %arg5: memref<32x64xbf16, #tpu.memory_space<vmem>>, %arg6: memref<16x64xf32, #tpu.memory_space<vmem>>) attributes {dimension_semantics = [#tpu.dimension_semantics<parallel>, #tpu.dimension_semantics<parallel>], iteration_bounds = array<i64: 1, 1>, scalar_prefetch = 0 : i64, scratch_operands = 0 : i64, tpu.core_type = #tpu.core_type<tc>, window_params = [{transform_indices = @transform_0, window_bounds = array<i64: 16, 32>}, {pipeline_mode = #tpu.pipeline_mode<synchronous>, transform_indices = @transform_1, window_bounds = array<i64: 1, 32>}, {pipeline_mode = #tpu.pipeline_mode<synchronous>, transform_indices = @transform_2, window_bounds = array<i64: 1, 32>}, {transform_indices = @transform_3, window_bounds = array<i64: 32, 64>}, {transform_indices = @transform_4, window_bounds = array<i64: 16, 64>}]} {
    %c0 = arith.constant 0 : index
    %c0_0 = arith.constant 0 : index
    %0 = vector.load %arg2[%c0, %c0_0] : memref<16x32xbf16, #tpu.memory_space<vmem>>, vector<16x32xbf16>
    %1 = arith.extf %0 : vector<16x32xbf16> to vector<16x32xf32>
    %cst = arith.constant dense<0.000000e+00> : vector<16xf32>
    %2 = vector.multi_reduction <add>, %1, %cst [1] : vector<16x32xf32> to vector<16xf32>
    %3 = vector.shape_cast %2 : vector<16xf32> to vector<16x1xf32>
    %cst_1 = arith.constant 3.200000e+01 : f32
    %4 = vector.broadcast %cst_1 : f32 to vector<16x1xf32>
    %5 = arith.divf %3, %4 : vector<16x1xf32>
    %6 = vector.broadcast %5 : vector<16x1xf32> to vector<16x32xf32>
    %7 = arith.subf %1, %6 : vector<16x32xf32>
    %8 = arith.mulf %7, %7 : vector<16x32xf32>
    %cst_2 = arith.constant dense<0.000000e+00> : vector<16xf32>
    %9 = vector.multi_reduction <add>, %8, %cst_2 [1] : vector<16x32xf32> to vector<16xf32>
    %10 = vector.shape_cast %9 : vector<16xf32> to vector<16x1xf32>
    %cst_3 = arith.constant 3.200000e+01 : f32
    %11 = vector.broadcast %cst_3 : f32 to vector<16x1xf32>
    %12 = arith.divf %10, %11 : vector<16x1xf32>
    %13 = vector.broadcast %5 : vector<16x1xf32> to vector<16x32xf32>
    %14 = arith.subf %1, %13 : vector<16x32xf32>
    %cst_4 = arith.constant 9.99999974E-6 : f32
    %15 = vector.broadcast %cst_4 : f32 to vector<16x1xf32>
    %16 = arith.addf %12, %15 : vector<16x1xf32>
    %17 = math.rsqrt %16 : vector<16x1xf32>
    %18 = vector.broadcast %17 : vector<16x1xf32> to vector<16x32xf32>
    %19 = arith.mulf %14, %18 : vector<16x32xf32>
    %c0_5 = arith.constant 0 : index
    %c0_6 = arith.constant 0 : index
    %20 = vector.load %arg3[%c0_5, %c0_6] : memref<1x32xf32, #tpu.memory_space<vmem>>, vector<1x32xf32>
    %21 = vector.broadcast %20 : vector<1x32xf32> to vector<16x32xf32>
    %22 = arith.mulf %19, %21 : vector<16x32xf32>
    %c0_7 = arith.constant 0 : index
    %c0_8 = arith.constant 0 : index
    %23 = vector.load %arg4[%c0_7, %c0_8] : memref<1x32xf32, #tpu.memory_space<vmem>>, vector<1x32xf32>
    %24 = vector.broadcast %23 : vector<1x32xf32> to vector<16x32xf32>
    %25 = arith.addf %22, %24 : vector<16x32xf32>
    %26 = arith.truncf %25 : vector<16x32xf32> to vector<16x32xbf16>
    %c0_9 = arith.constant 0 : index
    %c0_10 = arith.constant 0 : index
    %27 = vector.load %arg5[%c0_9, %c0_10] : memref<32x64xbf16, #tpu.memory_space<vmem>>, vector<32x64xbf16>
    %cst_11 = arith.constant dense<0.000000e+00> : vector<16x64xf32>
    %28 = tpu.matmul %26, %27, %cst_11 {dimension_numbers = #tpu.dot_dimension_numbers<[1], [0], [0], [1], [0, 0, 1, 1], [], []>} : vector<16x32xbf16>, vector<32x64xbf16>, vector<16x64xf32> -> vector<16x64xf32>
    %c0_12 = arith.constant 0 : index
    %c0_13 = arith.constant 0 : index
    %29 = vector.load %arg6[%c0_12, %c0_13] : memref<16x64xf32, #tpu.memory_space<vmem>>, vector<16x64xf32>
    tpu.vector_store %arg6[%c0_12, %c0_13], %28 {strides = array<i32>} : memref<16x64xf32, #tpu.memory_space<vmem>>, vector<16x64xf32>,
    return
  }
  func.func @transform_0(%arg0: i32, %arg1: i32) -> (i32, i32) {
    %c0_i32 = arith.constant 0 : i32
    %c0_i32_0 = arith.constant 0 : i32
    return %arg0, %c0_i32 : i32, i32
  }
  func.func @transform_1(%arg0: i32, %arg1: i32) -> (i32, i32) {
    %c0_i32 = arith.constant 0 : i32
    %c0_i32_0 = arith.constant 0 : i32
    %c0_i32_1 = arith.constant 0 : i32
    return %c0_i32, %c0_i32_0 : i32, i32
  }
  func.func @transform_2(%arg0: i32, %arg1: i32) -> (i32, i32) {
    %c0_i32 = arith.constant 0 : i32
    %c0_i32_0 = arith.constant 0 : i32
    %c0_i32_1 = arith.constant 0 : i32
    return %c0_i32, %c0_i32_0 : i32, i32
  }
  func.func @transform_3(%arg0: i32, %arg1: i32) -> (i32, i32) {
    %c0_i32 = arith.constant 0 : i32
    %c0_i32_0 = arith.constant 0 : i32
    return %c0_i32, %arg1 : i32, i32
  }
  func.func @transform_4(%arg0: i32, %arg1: i32) -> (i32, i32) {
    %c0_i32 = arith.constant 0 : i32
    return %arg0, %arg1 : i32, i32
  }
}

module attributes {stable_mosaic.version = 11 : i64} {
  func.func @_linear_kernel(%arg0: i32, %arg1: i32, %arg2: i32, %arg3: memref<16x32xbf16, #tpu.memory_space<vmem>>, %arg4: memref<32x32xbf16, #tpu.memory_space<vmem>>, %arg5: memref<1x32xf32, #tpu.memory_space<vmem>>, %arg6: memref<16x32xbf16, #tpu.memory_space<vmem>>, %arg7: memref<16x32xbf16, #tpu.memory_space<vmem>>, %arg8: memref<16x32xf32, #tpu.memory_space<vmem>>) attributes {dimension_semantics = [#tpu.dimension_semantics<parallel>, #tpu.dimension_semantics<parallel>, #tpu.dimension_semantics<arbitrary>], iteration_bounds = array<i64: 1, 1, 1>, scalar_prefetch = 0 : i64, scratch_operands = 1 : i64, tpu.core_type = #tpu.core_type<tc>, window_params = [{transform_indices = @transform_0, window_bounds = array<i64: 16, 32>}, {transform_indices = @transform_1, window_bounds = array<i64: 32, 32>}, {transform_indices = @transform_2, window_bounds = array<i64: 1, 32>}, {transform_indices = @transform_3, window_bounds = array<i64: 16, 32>}, {transform_indices = @transform_4, window_bounds = array<i64: 16, 32>}]} {
    %c0_i32 = arith.constant 0 : i32
    %0 = arith.cmpi eq, %arg2, %c0_i32 : i32
    %1 = arith.extui %0 : i1 to i32
    %c0_i32_0 = arith.constant 0 : i32
    %2 = arith.cmpi ne, %1, %c0_i32_0 : i32
    scf.if %2 {
      %cst_10 = arith.constant 0.000000e+00 : f32
      %12 = vector.broadcast %cst_10 : f32 to vector<16x32xf32>
      %c0_11 = arith.constant 0 : index
      %c0_12 = arith.constant 0 : index
      %13 = vector.load %arg8[%c0_11, %c0_12] : memref<16x32xf32, #tpu.memory_space<vmem>>, vector<16x32xf32>
      tpu.vector_store %arg8[%c0_11, %c0_12], %12 {strides = array<i32>} : memref<16x32xf32, #tpu.memory_space<vmem>>, vector<16x32xf32>,
    } else {
    }
    %c0 = arith.constant 0 : index
    %c0_1 = arith.constant 0 : index
    %3 = vector.load %arg8[%c0, %c0_1] : memref<16x32xf32, #tpu.memory_space<vmem>>, vector<16x32xf32>
    %c0_2 = arith.constant 0 : index
    %c0_3 = arith.constant 0 : index
    %4 = vector.load %arg3[%c0_2, %c0_3] : memref<16x32xbf16, #tpu.memory_space<vmem>>, vector<16x32xbf16>
    %c0_4 = arith.constant 0 : index
    %c0_5 = arith.constant 0 : index
    %5 = vector.load %arg4[%c0_4, %c0_5] : memref<32x32xbf16, #tpu.memory_space<vmem>>, vector<32x32xbf16>
    %cst = arith.constant dense<0.000000e+00> : vector<16x32xf32>
    %6 = tpu.matmul %4, %5, %cst {dimension_numbers = #tpu.dot_dimension_numbers<[1], [0], [0], [1], [0, 0, 1, 1], [], []>} : vector<16x32xbf16>, vector<32x32xbf16>, vector<16x32xf32> -> vector<16x32xf32>
    %7 = arith.addf %3, %6 : vector<16x32xf32>
    %c0_6 = arith.constant 0 : index
    %c0_7 = arith.constant 0 : index
    %8 = vector.load %arg8[%c0_6, %c0_7] : memref<16x32xf32, #tpu.memory_space<vmem>>, vector<16x32xf32>
    tpu.vector_store %arg8[%c0_6, %c0_7], %7 {strides = array<i32>} : memref<16x32xf32, #tpu.memory_space<vmem>>, vector<16x32xf32>,
    %c0_i32_8 = arith.constant 0 : i32
    %9 = arith.cmpi eq, %arg2, %c0_i32_8 : i32
    %10 = arith.extui %9 : i1 to i32
    %c0_i32_9 = arith.constant 0 : i32
    %11 = arith.cmpi ne, %10, %c0_i32_9 : i32
    scf.if %11 {
      %c0_10 = arith.constant 0 : index
      %c0_11 = arith.constant 0 : index
      %12 = vector.load %arg8[%c0_10, %c0_11] : memref<16x32xf32, #tpu.memory_space<vmem>>, vector<16x32xf32>
      %c0_12 = arith.constant 0 : index
      %c0_13 = arith.constant 0 : index
      %13 = vector.load %arg5[%c0_12, %c0_13] : memref<1x32xf32, #tpu.memory_space<vmem>>, vector<1x32xf32>
      %14 = vector.broadcast %13 : vector<1x32xf32> to vector<16x32xf32>
      %15 = arith.addf %12, %14 : vector<16x32xf32>
      %c0_14 = arith.constant 0 : index
      %c0_15 = arith.constant 0 : index
      %16 = vector.load %arg6[%c0_14, %c0_15] : memref<16x32xbf16, #tpu.memory_space<vmem>>, vector<16x32xbf16>
      %17 = arith.extf %16 : vector<16x32xbf16> to vector<16x32xf32>
      %18 = arith.addf %15, %17 : vector<16x32xf32>
      %19 = arith.truncf %18 : vector<16x32xf32> to vector<16x32xbf16>
      %c0_16 = arith.constant 0 : index
      %c0_17 = arith.constant 0 : index
      %20 = vector.load %arg7[%c0_16, %c0_17] : memref<16x32xbf16, #tpu.memory_space<vmem>>, vector<16x32xbf16>
      tpu.vector_store %arg7[%c0_16, %c0_17], %19 {strides = array<i32>} : memref<16x32xbf16, #tpu.memory_space<vmem>>, vector<16x32xbf16>,
    } else {
    }
    return
  }
  func.func @transform_0(%arg0: i32, %arg1: i32, %arg2: i32) -> (i32, i32) {
    %c0_i32 = arith.constant 0 : i32
    return %arg0, %arg2 : i32, i32
  }
  func.func @transform_1(%arg0: i32, %arg1: i32, %arg2: i32) -> (i32, i32) {
    %c0_i32 = arith.constant 0 : i32
    return %arg2, %arg1 : i32, i32
  }
  func.func @transform_2(%arg0: i32, %arg1: i32, %arg2: i32) -> (i32, i32) {
    %c0_i32 = arith.constant 0 : i32
    %c0_i32_0 = arith.constant 0 : i32
    return %c0_i32, %arg1 : i32, i32
  }
  func.func @transform_3(%arg0: i32, %arg1: i32, %arg2: i32) -> (i32, i32) {
    %c0_i32 = arith.constant 0 : i32
    return %arg0, %arg1 : i32, i32
  }
  func.func @transform_4(%arg0: i32, %arg1: i32, %arg2: i32) -> (i32, i32) {
    %c0_i32 = arith.constant 0 : i32
    return %arg0, %arg1 : i32, i32
  }
}

</mosaic_0001>

<bundles_post_ra>
// kernel: cvae_decoder_forward.12
= control target key start
LH: loop header
LB: loop body
LE: loop exit
PB: predicated region body
PF: predicated region fallthrough
CT: control target
= control target key end

     0   :  { %vm16_vm0 = vcmask 517120   ;;  %v99_v0 = vmov 0.0   ;;  %vm100_vm1 = vmmov 0   ;;  %vm28_vm2 = vcmask 130048   ;;  %s127_s1 = inlined_call_operand.vmem [shape: bf16[16,64], index: 1, kind: input, shape index: {}]   ;;  %s128_s0 = inlined_call_operand.vmem [shape: bf16[2,16], index: 0, kind: input, shape index: {}]   ;;  %s129_s2 = inlined_call_operand.vmem [shape: bf16[2,64], index: 2, kind: output, shape index: {}]  }
   0x1   :  { %17 = vst.msk [vmem:[#allocation2] sm:$0x3] %vm16_vm0, %v99_v0  ;;  %90 = vmatprep.subr.bf16.mxu0 %v99_v0  ;;  %v98_v1 = vld [vmem:[%s127_s1] sm:$0xff]   ;;  %92 = vmatprep.mubr.msk.bf16.mxu0 %vm100_vm1, %v99_v0  ;;  %vm80_vm3 = vcmask 516096  }
   0x2   :  { %91 = vmatpush3.bf16.msra.mxu0 %v98_v1  ;;  %v19_v2 = vld [vmem:[%s128_s0] sm:$0x1] }
   0x5   :  { %93 = vmatmul.mubr.msk.bf16.vlgmr.msra.gmra.mrb[0].mxu0 %vm28_vm2, %v19_v2 }
   0x8   :  { %v18_v3 = vld [vmem:[#allocation2] sm:$0x3] }
  0xd8   :  { %v66_v4 = vpop.f32.mrb[0].mxu0 }
  0xd9   :  { %v72_v5 = vadd.f32 %v66_v4, %v18_v3  ;;  %v94_v6 = vpop.f32.mrb[1].mxu0 }
  0xda   :  { %v69_v7 = vpop.f32.mrb[2].mxu0 }
  0xdb   :  { %74 = vst.msk [vmem:[#allocation2] sm:$0x3] %vm16_vm0, %v72_v5  ;;  %v95_v8 = vpop.f32.mrb[3].mxu0 }
  0xe2   :  { %v78_v9 = vld [vmem:[#allocation2] sm:$0x3] }
  0xe3   :  { %v79_v10 = vpack.c.bf16 %v78_v9, %v78_v9 }
  0xe5   :  { %81 = vst.msk [vmem:[%s129_s2] sm:$0x1] %vm80_vm3, %v79_v10 }

// kernel: cvae_decoder_forward.14
= control target key start
LH: loop header
LB: loop body
LE: loop exit
PB: predicated region body
PF: predicated region fallthrough
CT: control target
= control target key end

     0   :  { %vm23_vm0 = vcmask 254976   ;;  %v152_v9 = vmov 0.0   ;;  %vm153_vm1 = vmmov 0   ;;  %vm78_vm2 = vcmask 261120   ;;  %s205_s0 = inlined_call_operand.vmem [shape: bf16[2,32], index: 0, kind: input, shape index: {}]   ;;  %s206_s3 = inlined_call_operand.vmem [shape: bf16[32,96], index: 3, kind: input, shape index: {}]   ;;  %s207_s1 = inlined_call_operand.vmem [shape: f32[1,32], index: 1, kind: input, shape index: {}]   ;;  %s208_s2 = inlined_call_operand.vmem [shape: f32[1,32], index: 2, kind: input, shape index: {}]   ;;  %s209_s4 = inlined_call_operand.vmem [shape: f32[1,96], index: 4, kind: input, shape index: {}]   ;;  %s210_s5 = inlined_call_operand.vmem [shape: bf16[2,96], index: 5, kind: output, shape index: {}]  }
   0x1   :  { %v21_v0 = vld [vmem:[%s205_s0] sm:$0x1]  ;;  %138 = vmatprep.subr.bf16.mxu0 %v152_v9  ;;  %v149_v10 = vld [vmem:[%s206_s3 + $0x8] sm:$0xff]   ;;  %142 = vmatprep.mubr.msk.bf16.mxu0 %vm153_vm1, %v152_v9  ;;  %vm123_vm3 = vcmask 778240  }
   0x2   :  { %v22_v1 = vunpack.c.l.bf16 %v21_v0  ;;  %v148_v8 = vld [vmem:[%s206_s3] sm:$0xff]  }
   0x3   :  { %139 = vmatpush3.bf16.msra.mxu0 %v148_v8  ;;  %v129_v15 = vld [vmem:[%s207_s1] ss:$0 sm:$0xff] }
   0x4   :  { %v24_v2 = vsel %vm23_vm0, %v22_v1, 0.0  ;;  %140 = vmatprep.subr.bf16.mxu0 %v152_v9  ;;  %v130_v17 = vld [vmem:[%s208_s2] ss:$0 sm:$0xff] }
   0x5   :  { %25 = vadd.xlane.f32.xlu0 %v24_v2  ;;  %v131_v21 = vld [vmem:[%s209_s4] ss:$0 sm:$0xff] }
   0x7   :  { %141 = vmatpush3.bf16.msra.mxu0 %v149_v10 }
  0x92   :  { %v26_v3 = vpop.xlane.xlu0 %25 }
  0x93   :  { %v28_v4 = vmul.f32 0.03125, %v26_v3 }
  0x95   :  { %v29_v5 = vsub.f32 %v22_v1, %v28_v4 }
  0x97   :  { %v30_v6 = vmul.f32 %v29_v5, %v29_v5 }
  0x99   :  { %v31_v7 = vsel %vm23_vm0, %v30_v6, 0.0 }
  0x9a   :  { %32 = vadd.xlane.f32.xlu0 %v31_v7 }
 0x127   :  { %v33_v11 = vpop.xlane.xlu0 %32 }
 0x128   :  { %v34_v12 = vmul.f32 0.03125, %v33_v11 }
 0x12a   :  { %v35_v13 = vadd.f32 1e-05, %v34_v12 }
 0x12c   :  { %150 = vrsqrt.f32 %v35_v13 }
 0x136   :  { %v151_v14 = vpop.eup %150 }
 0x137   :  { %v37_v16 = vmul.f32 %v151_v14, %v29_v5 }
 0x139   :  { %v45_v18 = vmul.f32 %v129_v15, %v37_v16 }
 0x13b   :  { %v53_v19 = vadd.f32 %v130_v17, %v45_v18 }
 0x13d   :  { %v54_v20 = vpack.c.bf16 %v53_v19, %v53_v19 }
 0x13f   :  { %143 = vmatmul.mubr.msk.bf16.vlgmr.msra.gmra.mrb[0].mxu0 %vm78_vm2, %v54_v20 }
 0x212   :  { %v116_v22 = vpop.f32.mrb[0].mxu0 }
 0x213   :  { %v117_v23 = vadd.f32 %v131_v21, %v116_v22  ;;  %v144_v24 = vpop.f32.mrb[1].mxu0 }
 0x214   :  { %v119_v25 = vpop.f32.mrb[2].mxu0 }
 0x215   :  { %v122_v26 = vpack.c.bf16 %v117_v23, %v117_v23  ;;  %v145_v27 = vpop.f32.mrb[3].mxu0 }
 0x217   :  { %124 = vst.msk [vmem:[%s210_s5] sm:$0x1] %vm123_vm3, %v122_v26 }

// kernel: cvae_decoder_forward.13
= control target key start
LH: loop header
LB: loop body
LE: loop exit
PB: predicated region body
PF: predicated region fallthrough
CT: control target
= control target key end

     0   :  { %vm25_vm0 = vcmask 261120   ;;  %v187_v16 = vmov 0.0   ;;  %vm188_vm1 = vmmov 0   ;;  %vm147_vm2 = vcmask 781312   ;;  %s248_s0 = inlined_call_operand.vmem [shape: bf16[16,32], index: 0, kind: input, shape index: {}]   ;;  %s249_s3 = inlined_call_operand.vmem [shape: bf16[32,96], index: 3, kind: input, shape index: {}]   ;;  %s250_s1 = inlined_call_operand.vmem [shape: f32[1,32], index: 1, kind: input, shape index: {}]   ;;  %s251_s2 = inlined_call_operand.vmem [shape: f32[1,32], index: 2, kind: input, shape index: {}]   ;;  %s252_s4 = inlined_call_operand.vmem [shape: f32[1,96], index: 4, kind: input, shape index: {}]   ;;  %s253_s5 = inlined_call_operand.vmem [shape: bf16[16,96], index: 5, kind: output, shape index: {}]  }
   0x1   :  { %v165_v0 = vld [vmem:[%s248_s0] sm:$0xff]   ;;  %171 = vmatprep.subr.bf16.mxu0 %v187_v16  ;;  %v182_v17 = vld [vmem:[%s249_s3 + $0x8] sm:$0xff]   ;;  %175 = vmatprep.mubr.msk.bf16.mxu0 %vm188_vm1, %v187_v16 }
   0x2   :  { %v166_v1 = vunpack.c.l.bf16 %v165_v0  ;;  %v167_v2 = vunpack.c.h.bf16 %v165_v0  ;;  %v181_v15 = vld [vmem:[%s249_s3] sm:$0xff]  }
   0x3   :  { %172 = vmatpush3.bf16.msra.mxu0 %v181_v15  ;;  %v154_v26 = vld [vmem:[%s250_s1] ss:$0 sm:$0xff] }
   0x4   :  { %v26_v3 = vsel %vm25_vm0, %v166_v1, 0.0  ;;  %v29_v4 = vsel %vm25_vm0, %v167_v2, 0.0  ;;  %173 = vmatprep.subr.bf16.mxu0 %v187_v16  ;;  %v155_v30 = vld [vmem:[%s251_s2] ss:$0 sm:$0xff] }
   0x5   :  { %27 = vadd.xlane.f32.xlu0 %v26_v3  ;;  %v156_v35 = vld [vmem:[%s252_s4] ss:$0 sm:$0xff] }
   0x7   :  { %174 = vmatpush3.bf16.msra.mxu0 %v182_v17 }
   0x9   :  { %30 = vadd.xlane.f32.xlu0 %v29_v4 }
  0x92   :  { %v28_v5 = vpop.xlane.xlu0 %27 }
  0x93   :  { %v33_v6 = vmul.f32 0.03125, %v28_v5 }
  0x95   :  { %v35_v7 = vsub.f32 %v166_v1, %v33_v6 }
  0x96   :  { %v31_v8 = vpop.xlane.xlu0 %30 }
  0x97   :  { %v34_v9 = vmul.f32 0.03125, %v31_v8  ;;  %v37_v10 = vmul.f32 %v35_v7, %v35_v7 }
  0x99   :  { %v36_v11 = vsub.f32 %v167_v2, %v34_v9  ;;  %v39_v12 = vsel %vm25_vm0, %v37_v10, 0.0 }
  0x9a   :  { %40 = vadd.xlane.f32.xlu1 %v39_v12 }
  0x9b   :  { %v38_v13 = vmul.f32 %v36_v11, %v36_v11 }
  0x9d   :  { %v42_v14 = vsel %vm25_vm0, %v38_v13, 0.0 }
  0x9e   :  { %43 = vadd.xlane.f32.xlu1 %v42_v14 }
 0x127   :  { %v41_v18 = vpop.xlane.xlu1 %40 }
 0x128   :  { %v45_v19 = vmul.f32 0.03125, %v41_v18 }
 0x12a   :  { %v47_v20 = vadd.f32 1e-05, %v45_v19 }
 0x12b   :  { %v44_v21 = vpop.xlane.xlu1 %43 }
 0x12c   :  { %183 = vrsqrt.f32 %v47_v20  ;;  %v46_v22 = vmul.f32 0.03125, %v44_v21 }
 0x12e   :  { %v48_v23 = vadd.f32 1e-05, %v46_v22 }
 0x130   :  { %185 = vrsqrt.f32 %v48_v23 }
 0x136   :  { %v184_v24 = vpop.eup %183 }
 0x137   :  { %v51_v25 = vmul.f32 %v184_v24, %v35_v7 }
 0x139   :  { %v60_v29 = vmul.f32 %v154_v26, %v51_v25 }
 0x13a   :  { %v186_v27 = vpop.eup %185 }
 0x13b   :  { %v52_v28 = vmul.f32 %v186_v27, %v36_v11  ;;  %v69_v32 = vadd.f32 %v155_v30, %v60_v29 }
 0x13d   :  { %v61_v31 = vmul.f32 %v154_v26, %v52_v28 }
 0x13f   :  { %v70_v33 = vadd.f32 %v155_v30, %v61_v31 }
 0x141   :  { %v71_v34 = vpack.c.bf16 %v70_v33, %v69_v32 }
 0x143   :  { %176 = vmatmul.mubr.msk.bf16.vlgmr.msra.gmra.mrb[0].mxu0 %vm25_vm0, %v71_v34 }
 0x216   :  { %v132_v36 = vpop.f32.mrb[0].mxu0 }
 0x217   :  { %v133_v37 = vadd.f32 %v156_v35, %v132_v36  ;;  %v177_v38 = vpop.f32.mrb[1].mxu0 }
 0x218   :  { %v135_v39 = vpop.f32.mrb[2].mxu0 }
 0x219   :  { %v162_v40 = vpack.c.bf16 %v133_v37, %v133_v37  ;;  %v136_v41 = vadd.f32 %v156_v35, %v135_v39  ;;  %v178_v42 = vpop.f32.mrb[3].mxu0 }
 0x21b   :  { %148 = vst.msk [vmem:[%s253_s5] sm:$0xf] %vm147_vm2, %v162_v40  ;;  %v163_v43 = vpack.c.bf16 %v136_v41, %v136_v41 }
 0x21d   :  { %149 = vst.msk [vmem:[%s253_s5 + $0x4] sm:$0xf] %vm147_vm2, %v163_v43 }

// kernel: cvae_decoder_forward.15
= control target key start
LH: loop header
LB: loop body
LE: loop exit
PB: predicated region body
PF: predicated region fallthrough
CT: control target
= control target key end

     0   :  { %s753_s9 = smov 0   ;;  %s842_s0 = inlined_call_operand.vmem [shape: bf16[2,8,96], index: 0, kind: input, shape index: {}]   ;;  %s843_s1 = inlined_call_operand.vmem [shape: bf16[2,1,96], index: 1, kind: input, shape index: {}]   ;;  %s844_s2 = inlined_call_operand.vmem [shape: bf16[2,8,32], index: 2, kind: output, shape index: {}]  }
   0x1 LB: > { %s623_s10 = sadd.s32 4294967295, %s726_s9   ;;  %p627_p0 = scmp.ge.s32.totalorder %s726_s9, 1  ;;  %s726_s9 = sphi %s753_s9, %s12_s9  }
   0x2   : > { %p119_p1 = scmp.lt.s32.totalorder %s726_s9, 3 }
   0x4   : > { %p120_p2 = pnand %p627_p0, %p119_p1 }
   0x5   : > { %p142_p3 = scmp.lt.s32.totalorder (!%p120_p2), %s623_s10, 1  ;;  %v728_v0 = vmov (!%p120_p2), 0.0   ;;  %vm729_vm0 = vmmov (!%p120_p2), 0   ;;  %v156_v1 = vlaneseq (!%p120_p2)  ;;  %v730_v2 = vmov (!%p120_p2), 1966171168   ;;  %s731_s18 = smov (!%p120_p2), 96  }
   0x6   : > { %123 = sbr.rel (%p120_p2) target bundleno = 1930 (0x78a), region = 28  ;;  %651 = vmatprep.subr.bf16.mxu0 (!%p120_p2), %v728_v0  ;;  %653 = vmatprep.mubr.msk.bf16.mxu0 (!%p120_p2), %vm729_vm0, %v728_v0  ;;  %v217_v3 = vunpack.c.l.s4 (!%p120_p2), %v730_v2  ;;  %vm166_vm1 = vcmask (!%p120_p2), 130048   ;;  %vm276_vm3 = vcmask (!%p120_p2), 64512   ;;  %v732_v28 = vmov (!%p120_p2), 0   ;;  %s733_s19 = smov (!%p120_p2), 80  }
   0x7   : > { %657 = vmatprep.subr.bf16.mxu1 (!%p120_p2), %v728_v0  ;;  %659 = vmatprep.mubr.msk.bf16.mxu1 (!%p120_p2), %vm729_vm0, %v728_v0  ;;  %v779_v5 = vshrl.u32 (!%p120_p2), %v156_v1, 7  ;;  %v159_v16 = vand.u32 (!%p120_p2), 127, %v156_v1  ;;  %s734_s20 = smov (!%p120_p2), 112   ;;  %s735_s21 = smov (!%p120_p2), 64   ;;  %vm325_vm4 = vcmask (!%p120_p2), 1043456   ;;  %vm559_vm5 = vcmask (!%p120_p2), 257024  }
   0x8   : > { %v218_v7 = vunpack.c.0.s8 (!%p120_p2), %v217_v3  ;;  %705 = vset.pattern.permute.xlu1 (!%p120_p2), %v732_v28  ;;  %706 = vset.pattern.permute.xlu0 (!%p120_p2), %v732_v28  ;;  %s736_s22 = smov (!%p120_p2), 48   ;;  %s737_s23 = smov (!%p120_p2), 16  }
   0x9   : > { %vm160_vm2 = vcmp.le.s32.totalorder (!%p120_p2), %v159_v16, %v779_v5 }
   0xa   : > { %v221_v9 = vsub.s32 (!%p120_p2), %v218_v7, %v779_v5 }
   0xd   : > { %s846_s10 = smov (!%p142_p3, %s623_s10), 1 }
   0xe   : > { %s628_s11 = sshll.u32 %s846_s10, 2  ;;  %s148_s17 = scalar_lea.vmem %s843_s1, %s846_s10 }
   0xf   : > { %s145_s14 = scalar_lea.vmem %s842_s0, %s628_s11  ;;  %v783_v8 = vld [vmem:[%s148_s17] sm:$0x1]  ;;  %s152_s26 = scalar_lea.vmem %s844_s2, %s628_s11 }
  0x10   : > { %v154_v4 = vld [vmem:[%s145_s14] sm:$0xf]  ;;  %v222_v10 = vrot.slane %v783_v8, %v221_v9 }
  0x11   : > { %v781_v6 = vcombine.low %v154_v4, %v154_v4 }
  0x12   : > { %v788_v11 = vrot.slane %v222_v10, %v221_v9 }
  0x13   : > { %164 = vrot.lane.b32.xlu0 %v781_v6, %s731_s18 }
  0x17   : > { %230 = vrot.lane.b32.xlu0 %v788_v11, %s731_s18 }
  0x85   : > { %v165_v12 = vpop.permute.xlu0 %164 }
  0x86   : > { %v171_v13 = vsel %vm166_vm1, %v165_v12, 0 }
  0x87   : > { %652 = vmatpush3.bf16.xpose.msra.mxu0 %v171_v13 }
  0x88   : > { %663 = vmatprep.subr.bf16.mxu0 %v728_v0 }
  0x89   : > { %v231_v14 = vpop.permute.xlu0 %230 }
  0x8a   : > { %v233_v15 = vsel %vm166_vm1, %v231_v14, 0 }
  0x8b   : > { %658 = vmatpush3.bf16.xpose.msra.mxu1 %v233_v15 }
  0x8c   : > { %669 = vmatprep.subr.bf16.mxu1 %v728_v0 }
  0x8e   : > { %654 = vmatmul.mubr.msk.bf16.vlgmr.msra.gmra.mrb[0].mxu0 %vm166_vm1, %v154_v4 }
  0x8f   : > { %665 = vmatprep.mubr.msk.bf16.mxu0 %vm729_vm0, %v728_v0 }
  0x92   : > { %660 = vmatmul.mubr.msk.bf16.vlgmr.msra.gmra.mrb[0].mxu1 %vm166_vm1, %v154_v4 }
  0x93   : > { %671 = vmatprep.mubr.msk.bf16.mxu1 %vm729_vm0, %v728_v0 }
 0x161   : > { %v207_v17 = vpop.f32.mrb[0].mxu0 }
 0x162   : > { %v213_v18 = vmul.f32 0.25, %v207_v17  ;;  %v655_v19 = vpop.f32.mrb[1].mxu0 }
 0x163   : > { %v210_v20 = vpop.f32.mrb[2].mxu0 }
 0x164   : > { %v656_v21 = vpop.f32.mrb[3].mxu0  ;;  %v214_v22 = vsel %vm160_vm2, %v213_v18, -1e+30 }
 0x165   : > { %v277_v23 = vsel %vm276_vm3, %v214_v22, -inf  ;;  %v269_v24 = vpop.f32.mrb[0].mxu1 }
 0x166   : > { %278 = vmax.xlane.f32.xlu1 %v277_v23  ;;  %v661_v25 = vpop.f32.mrb[1].mxu1  ;;  %v275_v29 = vmul.f32 0.25, %v269_v24 }
 0x167   : > { %v272_v26 = vpop.f32.mrb[2].mxu1  ;;  %v305_v25 = vunpack.c.l.bf16 %v783_v8 }
 0x168   : > { %v662_v27 = vpop.f32.mrb[3].mxu1  ;;  %v313_v26 = vsub.s32 0, %v779_v5 }
 0x16a   : > { %v314_v28 = vrot.slane %v305_v25, %v313_v26 }
 0x1f3   : > { %v279_v30 = vpop.xlane.xlu1 %278 }
 0x1f4   : > { %v280_v31 = vmax.f32 %v279_v30, %v275_v29 }
 0x1f6   : > { %v289_v32 = vsub.f32 %v275_v29, %v280_v31  ;;  %283 = vperm.xlu1 %705, %v280_v31  }
 0x1f8   : > { %v290_v41 = vmul.f32 1.442695, %v289_v32 }
 0x1fa   : > { %371 = vrot.lane.b32.xlu1 %v781_v6, %s733_s19 }
 0x1fe   : > { %369 = vrot.lane.b32.xlu1 %v781_v6, %s734_s20 }
 0x275   : > { %v284_v33 = vpop.permute.xlu1 %283 }
 0x276   : > { %v286_v34 = vsub.f32 %v214_v22, %v284_v33 }
 0x278   : > { %v287_v35 = vmul.f32 1.442695, %v286_v34 }
 0x279   : > { %v372_v38 = vpop.permute.xlu1 %371 }
 0x27a   : > { %708 = vpow2.f32 %v287_v35  ;;  %v377_v39 = vsel %vm166_vm1, %v372_v38, 0 }
 0x27b   : > { %670 = vmatpush3.bf16.xpose.msra.mxu1 %v377_v39  ;;  %710 = vpow2.f32 %v290_v41 }
 0x27c   : > { %681 = vmatprep.subr.bf16.mxu1 %v728_v0 }
 0x27d   : > { %v370_v40 = vpop.permute.xlu1 %369 }
 0x282   : > { %672 = vmatmul.mubr.msk.bf16.vlgmr.msra.gmra.mrb[4].mxu1 %vm166_vm1, %v370_v40 }
 0x283   : > { %683 = vmatprep.mubr.msk.bf16.mxu1 %vm729_vm0, %v728_v0 }
 0x284   : > { %v709_v36 = vpop.eup %708 }
 0x285   : > { %v292_v37 = vsel %vm276_vm3, %v709_v36, 0.0  ;;  %v711_v42 = vpop.eup %710 }
 0x286   : > { %293 = vadd.xlane.f32.xlu0 %v292_v37 }
 0x313   : > { %v294_v43 = vpop.xlane.xlu0 %293 }
 0x314   : > { %v295_v44 = vadd.f32 %v711_v42, %v294_v43 }
 0x316   : > { %712 = vrcp.f32 %v295_v44 }
 0x320   : > { %v713_v45 = vpop.eup %712 }
 0x321   : > { %299 = vperm.xlu1 %705, %v713_v45   ;;  %v304_v46 = vmul.f32 %v713_v45, %v711_v42 }
 0x325   : > { %316 = vrot.lane.b32.xlu1 %v781_v6, %s735_s21 }
 0x329   : > { %421 = vrot.lane.b32.xlu1 %v788_v11, %s733_s19 }
 0x355   : > { %v413_v47 = vpop.f32.mrb[4].mxu1 }
 0x356   : > { %v419_v48 = vmul.f32 0.25, %v413_v47  ;;  %v673_v49 = vpop.f32.mrb[5].mxu1 }
 0x357   : > { %v416_v50 = vpop.f32.mrb[6].mxu1 }
 0x358   : > { %v674_v51 = vpop.f32.mrb[7].mxu1  ;;  %v420_v52 = vsel %vm160_vm2, %v419_v48, -1e+30 }
 0x359   : > { %v467_v53 = vsel %vm276_vm3, %v420_v52, -inf }
 0x35a   : > { %468 = vmax.xlane.f32.xlu0 %v467_v53 }
 0x3a0   : > { %v300_v54 = vpop.permute.xlu1 %299 }
 0x3a1   : > { %v302_v55 = vmul.f32 %v709_v36, %v300_v54 }
 0x3a3   : > { %v303_v58 = vpack.c.bf16 %v302_v55, %v302_v55 }
 0x3a4   : > { %v317_v56 = vpop.permute.xlu1 %316 }
 0x3a5   : > { %v327_v57 = vsel %vm325_vm4, %v317_v56, 0 }
 0x3a6   : > { %664 = vmatpush3.bf16.msra.mxu0 %v327_v57 }
 0x3a7   : > { %675 = vmatprep.subr.bf16.mxu0 %v728_v0 }
 0x3a8   : > { %v422_v59 = vpop.permute.xlu1 %421 }
 0x3a9   : > { %666 = vmatmul.mubr.msk.bf16.vlgmr.msra.gmra.mrb[4].mxu0 %vm276_vm3, %v303_v58  ;;  %v424_v60 = vsel %vm166_vm1, %v422_v59, 0 }
 0x3aa   : > { %677 = vmatprep.mubr.msk.bf16.mxu0 %vm729_vm0, %v728_v0 }
 0x3af   : > { %676 = vmatpush3.bf16.xpose.msra.mxu0 %v424_v60 }
 0x3b6   : > { %678 = vmatmul.mubr.msk.bf16.vlgmr.msra.gmra.mrb[8].mxu0 %vm166_vm1, %v370_v40 }
 0x3e7   : > { %v469_v3 = vpop.xlane.xlu0 %468 }
 0x47c   : > { %v363_v61 = vpop.f32.mrb[4].mxu0 }
 0x47d   : > { %v667_v62 = vpop.f32.mrb[5].mxu0 }
 0x47e   : > { %v366_v63 = vpop.f32.mrb[6].mxu0 }
 0x47f   : > { %v668_v1 = vpop.f32.mrb[7].mxu0 }
 0x489   : > { %v460_v2 = vpop.f32.mrb[8].mxu0 }
 0x48a   : > { %v466_v4 = vmul.f32 0.25, %v460_v2  ;;  %v679_v7 = vpop.f32.mrb[9].mxu0 }
 0x48b   : > { %v463_v9 = vpop.f32.mrb[10].mxu0 }
 0x48c   : > { %v470_v10 = vmax.f32 %v469_v3, %v466_v4  ;;  %v680_v11 = vpop.f32.mrb[11].mxu0 }
 0x48e   : > { %v479_v12 = vsub.f32 %v466_v4, %v470_v10  ;;  %473 = vperm.xlu1 %705, %v470_v10  }
 0x490   : > { %v480_v17 = vmul.f32 1.442695, %v479_v12 }
 0x50d   : > { %v474_v13 = vpop.permute.xlu1 %473 }
 0x50e   : > { %v476_v0 = vsub.f32 %v420_v52, %v474_v13 }
 0x510   : > { %v477_v14 = vmul.f32 1.442695, %v476_v0 }
 0x512   : > { %714 = vpow2.f32 %v477_v14 }
 0x513   : > { %716 = vpow2.f32 %v480_v17 }
 0x51c   : > { %v715_v15 = vpop.eup %714 }
 0x51d   : > { %v482_v16 = vsel %vm276_vm3, %v715_v15, 0.0  ;;  %v717_v18 = vpop.eup %716 }
 0x51e   : > { %483 = vadd.xlane.f32.xlu0 %v482_v16 }
 0x534   : > { %501 = vrot.lane.b32.xlu0 %v781_v6, %s736_s22 }
 0x5ab   : > { %v484_v19 = vpop.xlane.xlu0 %483 }
 0x5ac   : > { %v485_v20 = vadd.f32 %v717_v18, %v484_v19 }
 0x5ae   : > { %718 = vrcp.f32 %v485_v20 }
 0x5af   : > { %v502_v21 = vpop.permute.xlu0 %501 }
 0x5b0   : > { %v511_v22 = vsel %vm325_vm4, %v502_v21, 0 }
 0x5b1   : > { %682 = vmatpush3.bf16.msra.mxu1 %v511_v22 }
 0x5b8   : > { %v719_v23 = vpop.eup %718 }
 0x5b9   : > { %489 = vperm.xlu1 %705, %v719_v23   ;;  %v494_v24 = vmul.f32 %v719_v23, %v717_v18 }
 0x5bd   : > { %497 = vperm.xlu1 %705, %v494_v24  }
 0x5c1   : > { %308 = vperm.xlu1 %705, %v304_v46  }
 0x638   : > { %v490_v6 = vpop.permute.xlu1 %489 }
 0x639   : > { %v492_v27 = vmul.f32 %v715_v15, %v490_v6 }
 0x63b   : > { %v493_v29 = vpack.c.bf16 %v492_v27, %v492_v27 }
 0x63c   : > { %v498_v30 = vpop.permute.xlu1 %497 }
 0x63d   : > { %v500_v31 = vmul.f32 %v498_v30, %v314_v28  ;;  %684 = vmatmul.mubr.msk.bf16.vlgmr.msra.gmra.mrb[8].mxu1 %vm276_vm3, %v493_v29 }
 0x63f   : > { %504 = vrot.lane.b32.xlu1 %v500_v31, %s736_s22 }
 0x640   : > { %v309_v32 = vpop.permute.xlu1 %308 }
 0x641   : > { %v315_v33 = vmul.f32 %v314_v28, %v309_v32 }
 0x643   : > { %319 = vrot.lane.b32.xlu1 %v315_v33, %s735_s21 }
 0x6b1   : > { %v505_v34 = vpop.permute.xlu1 %504 }
 0x6b5   : > { %v320_v38 = vpop.permute.xlu1 %319 }
 0x6b6   : > { %v364_v39 = vadd.f32 %v363_v61, %v320_v38 }
 0x710   : > { %v547_v35 = vpop.f32.mrb[8].mxu1 }
 0x711   : > { %v548_v36 = vadd.f32 %v547_v35, %v505_v34  ;;  %v685_v8 = vpop.f32.mrb[9].mxu1 }
 0x712   : > { %v550_v37 = vpop.f32.mrb[10].mxu1 }
 0x713   : > { %554 = vrot.lane.b32.xlu1 %v548_v36, %s737_s23  ;;  %v686_v5 = vpop.f32.mrb[11].mxu1 }
 0x785   : > { %v555_v40 = vpop.permute.xlu1 %554 }
 0x786   : > { %v557_v41 = vsel %vm166_vm1, %v364_v39, %v555_v40 }
 0x787   : > { %v558_v42 = vpack.c.bf16 %v557_v41, %v557_v41 }
 0x789   : > { %560 = vst.msk [vmem:[%s152_s26] sm:$0xf] %vm559_vm5, %v558_v42 }
 0x78a PF: > { %s12_s9 = sadd.s32 1, %s726_s9  }
 0x78b   : > { %p9_p4 = scmp.ge.s32.totalorder %s12_s9, 4  }
 0x78d   :  { %11 = sbr.rel (!%p9_p4) target bundleno = 1 (0x1), region = 61 }

// kernel: cvae_decoder_forward.16
= control target key start
LH: loop header
LB: loop body
LE: loop exit
PB: predicated region body
PF: predicated region fallthrough
CT: control target
= control target key end

     0   :  { %vm22_vm0 = vcmask 261120   ;;  %v163_v0 = vmov 0.0   ;;  %vm164_vm1 = vmmov 0   ;;  %vm127_vm2 = vcmask 257024   ;;  %s216_s1 = inlined_call_operand.vmem [shape: bf16[32,32], index: 1, kind: input, shape index: {}]   ;;  %s217_s0 = inlined_call_operand.vmem [shape: bf16[16,32], index: 0, kind: input, shape index: {}]   ;;  %s218_s3 = inlined_call_operand.vmem [shape: bf16[16,32], index: 3, kind: input, shape index: {}]   ;;  %s219_s2 = inlined_call_operand.vmem [shape: f32[1,32], index: 2, kind: input, shape index: {}]   ;;  %s220_s4 = inlined_call_operand.vmem [shape: bf16[16,32], index: 4, kind: output, shape index: {}]  }
   0x1   :  { %150 = vmatprep.subr.bf16.mxu0 %v163_v0  ;;  %v160_v1 = vld [vmem:[%s216_s1] sm:$0xff]   ;;  %154 = vmatprep.mubr.msk.bf16.mxu0 %vm164_vm1, %v163_v0  ;;  %23 = vst.msk [vmem:[#allocation2] sm:$0xff] %vm22_vm0, %v163_v0  ;;  %24 = vst.msk [vmem:[#allocation2 + $0x8] sm:$0xff] %vm22_vm0, %v163_v0  ;;  %v161_v2 = vld [vmem:[%s216_s1 + $0x8] sm:$0xff]  }
   0x2   :  { %151 = vmatpush3.bf16.msra.mxu0 %v160_v1  ;;  %v162_v3 = vld [vmem:[%s217_s0] sm:$0xff]  }
   0x3   :  { %152 = vmatprep.subr.bf16.mxu0 %v163_v0  ;;  %v144_v12 = vld [vmem:[%s218_s3] sm:$0xff]  }
   0x4   :  { %v138_v13 = vld [vmem:[%s219_s2] ss:$0 sm:$0xff]  ;;  %v145_v14 = vunpack.c.l.bf16 %v144_v12  ;;  %v146_v17 = vunpack.c.h.bf16 %v144_v12 }
   0x6   :  { %153 = vmatpush3.bf16.msra.mxu0 %v161_v2 }
   0x8   :  { %v25_v4 = vld [vmem:[#allocation2] sm:$0xff]  ;;  %v26_v6 = vld [vmem:[#allocation2 + $0x8] sm:$0xff] }
   0x9   :  { %155 = vmatmul.mubr.msk.bf16.vlgmr.msra.gmra.mrb[0].mxu0 %vm22_vm0, %v162_v3 }
  0xdc   :  { %v88_v5 = vpop.f32.mrb[0].mxu0 }
  0xdd   :  { %v95_v7 = vadd.f32 %v88_v5, %v25_v4  ;;  %v156_v8 = vpop.f32.mrb[1].mxu0 }
  0xde   :  { %v91_v9 = vpop.f32.mrb[2].mxu0 }
  0xdf   :  { %97 = vst.msk [vmem:[#allocation2] sm:$0xff] %vm22_vm0, %v95_v7  ;;  %v96_v10 = vadd.f32 %v91_v9, %v26_v6  ;;  %v157_v11 = vpop.f32.mrb[3].mxu0 }
  0xe1   :  { %98 = vst.msk [vmem:[#allocation2 + $0x8] sm:$0xff] %vm22_vm0, %v96_v10 }
  0xe6   :  { %v102_v15 = vld [vmem:[#allocation2] sm:$0xff] }
  0xe7   :  { %v111_v16 = vadd.f32 %v138_v13, %v102_v15 }
  0xe8   :  { %v103_v18 = vld [vmem:[#allocation2 + $0x8] sm:$0xff] }
  0xe9   :  { %v117_v19 = vadd.f32 %v145_v14, %v111_v16  ;;  %v112_v20 = vadd.f32 %v138_v13, %v103_v18 }
  0xeb   :  { %v141_v21 = vpack.c.bf16 %v117_v19, %v117_v19  ;;  %v118_v22 = vadd.f32 %v146_v17, %v112_v20 }
  0xed   :  { %128 = vst.msk [vmem:[%s220_s4] sm:$0xf] %vm127_vm2, %v141_v21  ;;  %v142_v23 = vpack.c.bf16 %v118_v22, %v118_v22 }
  0xef   :  { %129 = vst.msk [vmem:[%s220_s4 + $0x4] sm:$0xf] %vm127_vm2, %v142_v23 }

// kernel: cvae_decoder_forward.17
= control target key start
LH: loop header
LB: loop body
LE: loop exit
PB: predicated region body
PF: predicated region fallthrough
CT: control target
= control target key end

     0   :  { %vm35_vm0 = vcmask 261120   ;;  %v406_v16 = vmov 0.0   ;;  %vm407_vm1 = vmmov 0   ;;  %vm312_vm2 = vcmask 257024   ;;  %s519_s0 = inlined_call_operand.vmem [shape: bf16[16,32], index: 0, kind: input, shape index: {}]   ;;  %s520_s3 = inlined_call_operand.vmem [shape: bf16[32,128], index: 3, kind: input, shape index: {}]   ;;  %s521_s1 = inlined_call_operand.vmem [shape: f32[1,32], index: 1, kind: input, shape index: {}]   ;;  %s522_s2 = inlined_call_operand.vmem [shape: f32[1,32], index: 2, kind: input, shape index: {}]   ;;  %s523_s5 = inlined_call_operand.vmem [shape: bf16[128,32], index: 5, kind: input, shape index: {}]   ;;  %s524_s4 = inlined_call_operand.vmem [shape: f32[1,128], index: 4, kind: input, shape index: {}]   ;;  %s525_s6 = inlined_call_operand.vmem [shape: f32[1,32], index: 6, kind: input, shape index: {}]   ;;  %s526_s7 = inlined_call_operand.vmem [shape: bf16[16,32], index: 7, kind: output, shape index: {}]  }
   0x1   :  { %v339_v0 = vld [vmem:[%s519_s0] sm:$0xff]   ;;  %358 = vmatprep.subr.bf16.mxu0 %v406_v16  ;;  %83 = vst.msk [vmem:[#allocation3] sm:$0xff] %vm35_vm0, %v406_v16  ;;  %84 = vst.msk [vmem:[#allocation3 + $0x8] sm:$0xff] %vm35_vm0, %v406_v16  ;;  %366 = vmatprep.subr.bf16.mxu1 %v406_v16  ;;  %v389_v17 = vld [vmem:[%s520_s3 + $0x8] sm:$0xff]  }
   0x2   :  { %v451_v1 = vunpack.c.l.bf16 %v339_v0  ;;  %v453_v2 = vunpack.c.h.bf16 %v339_v0  ;;  %v388_v15 = vld [vmem:[%s520_s3] sm:$0xff]   ;;  %362 = vmatprep.mubr.msk.bf16.mxu0 %vm407_vm1, %v406_v16  ;;  %382 = vmatprep.mubr.msk.bf16.mxu1 %vm407_vm1, %v406_v16  ;;  %v391_v37 = vld [vmem:[%s523_s5 + $0x8] sm:$0xff]   ;;  %v392_v38 = vld [vmem:[%s523_s5 + $0x10] sm:$0xff]  }
   0x3   :  { %359 = vmatpush3.bf16.msra.mxu0 %v388_v15  ;;  %v319_v26 = vld [vmem:[%s521_s1] ss:$0 sm:$0xff]  ;;  %v393_v39 = vld [vmem:[%s523_s5 + $0x18] sm:$0xff]   ;;  %v395_v41 = vld [vmem:[%s523_s5 + $0x28] sm:$0xff]  }
   0x4   :  { %v36_v3 = vsel %vm35_vm0, %v451_v1, 0.0  ;;  %v39_v4 = vsel %vm35_vm0, %v453_v2, 0.0  ;;  %360 = vmatprep.subr.bf16.mxu0 %v406_v16  ;;  %v320_v30 = vld [vmem:[%s522_s2] ss:$0 sm:$0xff]  ;;  %v396_v42 = vld [vmem:[%s523_s5 + $0x30] sm:$0xff]   ;;  %v397_v43 = vld [vmem:[%s523_s5 + $0x38] sm:$0xff]  }
   0x5   :  { %37 = vadd.xlane.f32.xlu0 %v36_v3  ;;  %v390_v36 = vld [vmem:[%s523_s5] sm:$0xff]  }
   0x6   :  { %367 = vmatpush3.bf16.msra.mxu1 %v390_v36  ;;  %v394_v40 = vld [vmem:[%s523_s5 + $0x20] sm:$0xff]  }
   0x7   :  { %361 = vmatpush3.bf16.msra.mxu0 %v389_v17  ;;  %368 = vmatprep.subr.bf16.mxu1 %v406_v16  ;;  %v321_v44 = vld [vmem:[%s524_s4] ss:$0 sm:$0xff] }
   0x9   :  { %40 = vadd.xlane.f32.xlu0 %v39_v4 }
   0xa   :  { %369 = vmatpush3.bf16.msra.mxu1 %v391_v37 }
   0xb   :  { %370 = vmatprep.subr.bf16.mxu1 %v406_v16 }
   0xe   :  { %371 = vmatpush3.bf16.msra.mxu1 %v392_v38 }
   0xf   :  { %372 = vmatprep.subr.bf16.mxu1 %v406_v16 }
  0x12   :  { %373 = vmatpush3.bf16.msra.mxu1 %v393_v39 }
  0x13   :  { %374 = vmatprep.subr.bf16.mxu1 %v406_v16 }
  0x16   :  { %375 = vmatpush3.bf16.msra.mxu1 %v394_v40 }
  0x17   :  { %376 = vmatprep.subr.bf16.mxu1 %v406_v16 }
  0x1a   :  { %377 = vmatpush3.bf16.msra.mxu1 %v395_v41 }
  0x1b   :  { %378 = vmatprep.subr.bf16.mxu1 %v406_v16 }
  0x1e   :  { %379 = vmatpush3.bf16.msra.mxu1 %v396_v42 }
  0x1f   :  { %380 = vmatprep.subr.bf16.mxu1 %v406_v16  ;;  %v333_v16 = vld [vmem:[%s525_s6] ss:$0 sm:$0xff] }
  0x22   :  { %381 = vmatpush3.bf16.msra.mxu1 %v397_v43 }
  0x92   :  { %v38_v5 = vpop.xlane.xlu0 %37 }
  0x93   :  { %v43_v6 = vmul.f32 0.03125, %v38_v5 }
  0x95   :  { %v45_v7 = vsub.f32 %v451_v1, %v43_v6 }
  0x96   :  { %v41_v8 = vpop.xlane.xlu0 %40 }
  0x97   :  { %v44_v9 = vmul.f32 0.03125, %v41_v8  ;;  %v47_v10 = vmul.f32 %v45_v7, %v45_v7  ;;  %v172_v8 = vld [vmem:[#allocation3] sm:$0xff] }
  0x99   :  { %v46_v11 = vsub.f32 %v453_v2, %v44_v9  ;;  %v49_v12 = vsel %vm35_vm0, %v47_v10, 0.0  ;;  %v173_v10 = vld [vmem:[#allocation3 + $0x8] sm:$0xff] }
  0x9a   :  { %50 = vadd.xlane.f32.xlu1 %v49_v12 }
  0x9b   :  { %v48_v13 = vmul.f32 %v46_v11, %v46_v11 }
  0x9d   :  { %v52_v14 = vsel %vm35_vm0, %v48_v13, 0.0 }
  0x9e   :  { %53 = vadd.xlane.f32.xlu1 %v52_v14 }
 0x127   :  { %v51_v18 = vpop.xlane.xlu1 %50 }
 0x128   :  { %v55_v19 = vmul.f32 0.03125, %v51_v18 }
 0x12a   :  { %v57_v20 = vadd.f32 1e-05, %v55_v19 }
 0x12b   :  { %v54_v21 = vpop.xlane.xlu1 %53 }
 0x12c   :  { %398 = vrsqrt.f32 %v57_v20  ;;  %v56_v22 = vmul.f32 0.03125, %v54_v21 }
 0x12e   :  { %v58_v23 = vadd.f32 1e-05, %v56_v22 }
 0x130   :  { %400 = vrsqrt.f32 %v58_v23 }
 0x136   :  { %v399_v24 = vpop.eup %398 }
 0x137   :  { %v61_v25 = vmul.f32 %v399_v24, %v45_v7 }
 0x139   :  { %v70_v28 = vmul.f32 %v319_v26, %v61_v25 }
 0x13a   :  { %v401_v27 = vpop.eup %400 }
 0x13b   :  { %v62_v29 = vmul.f32 %v401_v27, %v46_v11  ;;  %v79_v32 = vadd.f32 %v320_v30, %v70_v28 }
 0x13d   :  { %v71_v31 = vmul.f32 %v319_v26, %v62_v29 }
 0x13f   :  { %v80_v33 = vadd.f32 %v320_v30, %v71_v31 }
 0x141   :  { %v81_v34 = vpack.c.bf16 %v80_v33, %v79_v32 }
 0x143   :  { %82 = vst.msk [vmem:[#allocation2] sm:$0xff] %vm35_vm0, %v81_v34 }
 0x14a   :  { %v85_v35 = vld [vmem:[#allocation2] sm:$0xff] }
 0x14b   :  { %363 = vmatmul.mubr.msk.bf16.vlgmr.msra.gmra.mrb[0].mxu0 %vm35_vm0, %v85_v35 }
 0x21e   :  { %v147_v45 = vpop.f32.mrb[0].mxu0 }
 0x21f   :  { %v148_v46 = vadd.f32 %v321_v44, %v147_v45  ;;  %v364_v47 = vpop.f32.mrb[1].mxu0 }
 0x220   :  { %v150_v48 = vpop.f32.mrb[2].mxu0 }
 0x221   :  { %v154_v49 = vmul.f32 %v148_v46, %v148_v46  ;;  %v151_v50 = vadd.f32 %v321_v44, %v150_v48  ;;  %v365_v51 = vpop.f32.mrb[3].mxu0 }
 0x223   :  { %v156_v52 = vmul.f32 %v154_v49, %v148_v46  ;;  %v155_v53 = vmul.f32 %v151_v50, %v151_v50 }
 0x225   :  { %v158_v54 = vmul.f32 0.044715, %v156_v52  ;;  %v157_v55 = vmul.f32 %v155_v53, %v151_v50 }
 0x227   :  { %v160_v56 = vadd.f32 %v158_v54, %v148_v46  ;;  %v159_v57 = vmul.f32 0.044715, %v157_v55 }
 0x229   :  { %v162_v58 = vmul.f32 0.7978846, %v160_v56  ;;  %v161_v59 = vadd.f32 %v159_v57, %v151_v50 }
 0x22b   :  { %402 = vtanh.f32 %v162_v58  ;;  %v163_v60 = vmul.f32 0.7978846, %v161_v59 }
 0x22d   :  { %404 = vtanh.f32 %v163_v60 }
 0x235   :  { %v403_v61 = vpop.eup %402 }
 0x236   :  { %v166_v62 = vadd.f32 1.0, %v403_v61 }
 0x237   :  { %v405_v63 = vpop.eup %404 }
 0x238   :  { %v167_v0 = vadd.f32 1.0, %v405_v63  ;;  %v168_v3 = vmul.f32 0.5, %v166_v62 }
 0x23a   :  { %v169_v4 = vmul.f32 0.5, %v167_v0  ;;  %v170_v5 = vmul.f32 %v168_v3, %v148_v46 }
 0x23c   :  { %v171_v6 = vmul.f32 %v169_v4, %v151_v50 }
 0x23e   :  { %v174_v7 = vpack.c.bf16 %v171_v6, %v170_v5 }
 0x240   :  { %383 = vmatmul.mubr.bf16.vlgmr.msra.gmra.mrb[0].mxu1 %v174_v7 }
 0x313   :  { %v273_v9 = vpop.f32.mrb[0].mxu1 }
 0x314   :  { %v280_v11 = vadd.f32 %v273_v9, %v172_v8  ;;  %v384_v12 = vpop.f32.mrb[1].mxu1 }
 0x315   :  { %v276_v13 = vpop.f32.mrb[2].mxu1 }
 0x316   :  { %282 = vst.msk [vmem:[#allocation3] sm:$0xff] %vm35_vm0, %v280_v11  ;;  %v281_v14 = vadd.f32 %v276_v13, %v173_v10  ;;  %v385_v15 = vpop.f32.mrb[3].mxu1 }
 0x318   :  { %283 = vst.msk [vmem:[#allocation3 + $0x8] sm:$0xff] %vm35_vm0, %v281_v14 }
 0x31d   :  { %v287_v17 = vld [vmem:[#allocation3] sm:$0xff] }
 0x31e   :  { %v296_v18 = vadd.f32 %v333_v16, %v287_v17 }
 0x31f   :  { %v288_v19 = vld [vmem:[#allocation3 + $0x8] sm:$0xff] }
 0x320   :  { %v302_v20 = vadd.f32 %v451_v1, %v296_v18  ;;  %v297_v21 = vadd.f32 %v333_v16, %v288_v19 }
 0x322   :  { %v336_v22 = vpack.c.bf16 %v302_v20, %v302_v20  ;;  %v303_v23 = vadd.f32 %v453_v2, %v297_v21 }
 0x324   :  { %313 = vst.msk [vmem:[%s526_s7] sm:$0xf] %vm312_vm2, %v336_v22  ;;  %v337_v24 = vpack.c.bf16 %v303_v23, %v303_v23 }
 0x326   :  { %314 = vst.msk [vmem:[%s526_s7 + $0x4] sm:$0xf] %vm312_vm2, %v337_v24 }

// kernel: cvae_decoder_forward.23
= control target key start
LH: loop header
LB: loop body
LE: loop exit
PB: predicated region body
PF: predicated region fallthrough
CT: control target
= control target key end

     0   :  { %vm23_vm0 = vcmask 261120   ;;  %s266_s0 = inlined_call_operand.vmem [shape: bf16[16,32], index: 0, kind: input, shape index: {}]   ;;  %s267_s1 = inlined_call_operand.vmem [shape: f32[1,32], index: 1, kind: input, shape index: {}]   ;;  %s268_s2 = inlined_call_operand.vmem [shape: f32[1,32], index: 2, kind: input, shape index: {}]   ;;  %s269_s3 = inlined_call_operand.vmem [shape: bf16[32,64], index: 3, kind: input, shape index: {}]   ;;  %s270_s4 = inlined_call_operand.hbm [shape: f32[16,64], index: 4, kind: output, shape index: {}]  }
   0x1   :  { %v155_v0 = vld [vmem:[%s266_s0] sm:$0xff]  }
   0x2   :  { %v156_v1 = vunpack.c.l.bf16 %v155_v0  ;;  %v157_v2 = vunpack.c.h.bf16 %v155_v0 }
   0x3   :  { %9 = vsyncpa [#allocation3], 0  ;;  %v174_v15 = vld [vmem:[%s269_s3] sm:$0xff]   ;;  %v204_v16 = vmov 0.0   ;;  %v175_v17 = vld [vmem:[%s269_s3 + $0x8] sm:$0xff]   ;;  %vm205_vm1 = vmmov 0  }
   0x4   :  { %v24_v3 = vsel %vm23_vm0, %v156_v1, 0.0  ;;  %v27_v4 = vsel %vm23_vm0, %v157_v2, 0.0  ;;  %161 = vmatprep.subr.bf16.mxu0 %v204_v16  ;;  %165 = vmatprep.mubr.msk.bf16.mxu0 %vm205_vm1, %v204_v16  ;;  %v149_v26 = vld [vmem:[%s267_s1] ss:$0 sm:$0xff]  ;;  %s206_s23 = smov [#allocation2]   ;;  %vm130_vm2 = vcmask 523264  }
   0x5   :  { %25 = vadd.xlane.f32.xlu0 %v24_v3  ;;  %162 = vmatpush3.bf16.msra.mxu0 %v174_v15  ;;  %v150_v30 = vld [vmem:[%s268_s2] ss:$0 sm:$0xff]  ;;  %s138_s24 = sshll.u32 %s206_s23, 4  ;;  %s139_s24 = int_to_ptr.vmem [resolvable:$true] %s138_s24 }
   0x6   :  { %163 = vmatprep.subr.bf16.mxu0 %v204_v16  ;;  %s180_s1 = scalar_lea.vmem %s139_s24, 256  ;;  %p185_p1 = scmp.lt.s32.totalorder %s139_s24, %s139_s24 }
   0x7   :  { %p181_p0 = scmp.ne.s32.totalorder %s139_s24, %s180_s1  ;;  %p186_p2 = scmp.lt.s32.totalorder %s180_s1, %s180_s1 }
   0x9   :  { %28 = vadd.xlane.f32.xlu0 %v27_v4  ;;  %164 = vmatpush3.bf16.msra.mxu0 %v175_v17  ;;  %p187_p3 = por %p186_p2, %p185_p1 }
   0xb   :  { %p188_p4 = pnand %p187_p3, %p181_p0 }
  0x92   :  { %v26_v5 = vpop.xlane.xlu0 %25 }
  0x93   :  { %v31_v6 = vmul.f32 0.03125, %v26_v5 }
  0x95   :  { %v33_v7 = vsub.f32 %v156_v1, %v31_v6 }
  0x96   :  { %v29_v8 = vpop.xlane.xlu0 %28 }
  0x97   :  { %v32_v9 = vmul.f32 0.03125, %v29_v8  ;;  %v35_v10 = vmul.f32 %v33_v7, %v33_v7 }
  0x99   :  { %v34_v11 = vsub.f32 %v157_v2, %v32_v9  ;;  %v37_v12 = vsel %vm23_vm0, %v35_v10, 0.0 }
  0x9a   :  { %38 = vadd.xlane.f32.xlu1 %v37_v12 }
  0x9b   :  { %v36_v13 = vmul.f32 %v34_v11, %v34_v11 }
  0x9d   :  { %v40_v14 = vsel %vm23_vm0, %v36_v13, 0.0 }
  0x9e   :  { %41 = vadd.xlane.f32.xlu1 %v40_v14 }
 0x127   :  { %v39_v18 = vpop.xlane.xlu1 %38 }
 0x128   :  { %v43_v19 = vmul.f32 0.03125, %v39_v18 }
 0x12a   :  { %v45_v20 = vadd.f32 1e-05, %v43_v19 }
 0x12b   :  { %v42_v21 = vpop.xlane.xlu1 %41 }
 0x12c   :  { %176 = vrsqrt.f32 %v45_v20  ;;  %v44_v22 = vmul.f32 0.03125, %v42_v21 }
 0x12e   :  { %v46_v23 = vadd.f32 1e-05, %v44_v22 }
 0x130   :  { %178 = vrsqrt.f32 %v46_v23 }
 0x136   :  { %v177_v24 = vpop.eup %176 }
 0x137   :  { %v49_v25 = vmul.f32 %v177_v24, %v33_v7 }
 0x139   :  { %v58_v29 = vmul.f32 %v149_v26, %v49_v25 }
 0x13a   :  { %v179_v27 = vpop.eup %178 }
 0x13b   :  { %v50_v28 = vmul.f32 %v179_v27, %v34_v11  ;;  %v67_v32 = vadd.f32 %v150_v30, %v58_v29 }
 0x13d   :  { %v59_v31 = vmul.f32 %v149_v26, %v50_v28 }
 0x13f   :  { %v68_v33 = vadd.f32 %v150_v30, %v59_v31 }
 0x141   :  { %v69_v34 = vpack.c.bf16 %v68_v33, %v67_v32 }
 0x143   :  { %166 = vmatmul.mubr.msk.bf16.vlgmr.msra.gmra.mrb[0].mxu0 %vm23_vm0, %v69_v34 }
 0x216   :  { %v123_v35 = vpop.f32.mrb[0].mxu0 }
 0x217   :  { %131 = vst.msk [vmem:[#allocation2] sm:$0xff] %vm130_vm2, %v123_v35  ;;  %v167_v36 = vpop.f32.mrb[1].mxu0 }
 0x218   :  { %v126_v37 = vpop.f32.mrb[2].mxu0 }
 0x219   :  { %132 = vst.msk [vmem:[#allocation2 + $0x8] sm:$0xff] %vm130_vm2, %v126_v37  ;;  %v168_v38 = vpop.f32.mrb[3].mxu0 }
 0x21a   :  { %191 = shalt.err (!%p188_p4)
}
 0x21b   :  { %s192_s26 = scalar_lea.hbm %s270_s4, 256 }
 0x21c   :  { %p193_p5 = scmp.ne.s32.totalorder %s270_s4, %s192_s26  ;;  %p196_p6 = scmp.lt.u32.totalorder %s192_s26, %s270_s4 }
 0x21e   :  { %p198_p7 = pnand %p196_p6, %p193_p5 }
 0x220   :  { %201 = shalt.err (!%p198_p7)
}
 0x221   :  { %s207_s5 = smov 128   ;;  %s208_s6 = smov 8  }
 0x222   :  { %144 = dma.vmem_to_hbm [thread:$0]  %s139_s24, 256, %s270_s4, [#allocation3], %s207_s5, %s207_s5, %s208_s6  }
 0x223   :  { %202 = dma.done.wait [#allocation3], 256  }
 0x224   :  { %203 = vsyncadd [#allocation3], 4294967040 }
 0x225   :  { %148 = vsyncpa [#allocation3], 1 }

</bundles_post_ra>
